<compile_context>
chip_gen: v6e
topology: v6e:2x2x1
jax: 0.10.0
libtpu: 0.0.40
codegen_flags: <defaults>
</compile_context>

<pallas_src>
import jax
import jax.numpy as jnp
from jax.experimental import pallas as pl
from jax.experimental.pallas import tpu as pltpu


# --------------------------------------------------------------------------- kernels
def _tp_linear_kernel_multi_k(x_ref, w_ref, b_ref, o_ref, acc_ref):
    """K-reduction variant: f32 VMEM accumulator persists across the K grid axis."""
    k = pl.program_id(2)
    x = x_ref[...].astype(w_ref.dtype)  # bf16 fast path casts activations here
    prod = jnp.dot(x, w_ref[...], preferred_element_type=jnp.float32)

    # First k-step assigns (skips the zero-init store + read-modify-write add);
    # later steps accumulate.
    @pl.when(k == 0)
    def _first():
        acc_ref[...] = prod

    @pl.when(k > 0)
    def _rest():
        acc_ref[...] += prod

    @pl.when(k == pl.num_programs(2) - 1)
    def _epilogue():
        o_ref[...] = (acc_ref[...] + b_ref[...].astype(jnp.float32)).astype(o_ref.dtype)


def _tp_linear_kernel_single_k(x_ref, w_ref, b_ref, o_ref):
    """Whole K reduction fits in one tile: no accumulator scratch / RMW at all."""
    x = x_ref[...].astype(w_ref.dtype)
    o_ref[...] = (
        jnp.dot(x, w_ref[...], preferred_element_type=jnp.float32)
        + b_ref[...].astype(jnp.float32)
    ).astype(o_ref.dtype)


# --------------------------------------------------------------------------- helpers
def _scoped_vmem_limit():
    """Generation-aware scoped-VMEM limit: ~75% of physical, capped at 96 MiB."""
    try:
        cap = int(pltpu.get_tpu_info().vmem_capacity_bytes)
    except Exception:
        cap = 64 << 20  # conservative default (v7x per-TC physical VMEM)
    return min((cap * 3) // 4, 96 << 20)


def _divisor_tile(dim, candidates):
    """Largest candidate that evenly divides `dim`, else None."""
    for c in candidates:
        if c <= dim and dim % c == 0:
            return c
    return None


# --------------------------------------------------------------------------- wrapper
class TensorParallelLinearWrapper:
    """JAX/Pallas analogue of TensorParallelWrapper(nn.Linear, {0:'split 1'}, {0:'scale'})."""

    def __init__(self, weight, bias, *, rank: int, world_size: int,
                 compute_dtype=None, tile_vmem_budget_bytes=None):
        # weight: (OUT, SHARD) torch Linear layout; bias: (OUT,)
        out_f, shard = weight.shape
        inv = 1.0 / float(world_size)
        # One-time transforms: transpose to (K, N) for the straight MXU path and fold
        # the "scale" output action (1/world_size) into the parameters.
        w_t = jnp.asarray(weight).T * inv                     # (SHARD, OUT)
        if compute_dtype is not None:
            w_t = w_t.astype(compute_dtype)                   # e.g. bf16 weights
        # TODO(synk): int8 (v5e/v6e MXU) or fp8-e4m3 (v7x MXU) weight quantization with
        # per-channel scales would halve weight HBM bytes again in the decode regime.
        self.weight_t = w_t
        self.bias = (jnp.asarray(bias) * inv).reshape(1, out_f).astype(jnp.float32)
        self.rank = int(rank)
        self.world_size = int(world_size)
        self.out_features = out_f
        self.shard = shard
        self.vmem_limit = _scoped_vmem_limit()
        # Budget used only for tile selection (overridable for testing the tiled path).
        self.tile_budget = int(tile_vmem_budget_bytes or self.vmem_limit)

    def __call__(self, x):
        B, hidden = x.shape
        out_f, shard, rank = self.out_features, self.shard, self.rank
        assert hidden == shard * self.world_size, "hidden must split evenly across ranks"

        x_bytes = jnp.dtype(x.dtype).itemsize
        w_bytes = jnp.dtype(self.weight_t.dtype).itemsize
        o_bytes = x_bytes
        budget = int(self.tile_budget * 0.8)

        # "split 1" input action.  If the shard is 128-lane aligned we fold the rank
        # offset into the x BlockSpec K block index so only the rank's shard is ever
        # DMA'd out of the full x.  Otherwise the x block's last dim would be neither a
        # multiple of 128 nor the full array extent, so fall back to a one-time XLA
        # slice of the rank's shard (kernel then sees the sliced array with tk = shard).
        fold_split = (shard % 128 == 0)
        x_in = x if fold_split else x[:, rank * shard:(rank + 1) * shard]

        # ---- tile selection (largest tiles that fit the VMEM budget) -------------
        tm = _divisor_tile(B, (512, 256, 128, 64, 32, 16, 8)) or B  # full B always legal

        if fold_split:
            tk_cands = [c for c in (shard, 2048, 1024, 512, 256, 128)
                        if c <= shard and shard % c == 0 and c % 128 == 0]
        else:
            tk_cands = [shard]
        tk_cands = list(dict.fromkeys(tk_cands))

        tn_cands = [c for c in (out_f, 2048, 1024, 512, 256, 128)
                    if c <= out_f and out_f % c == 0 and (c % 128 == 0 or c == out_f)]
        tn_cands = list(dict.fromkeys(tn_cands)) or [out_f]

        def footprint(tm_, tk_, tn_, multi_k):
            f = 2 * tm_ * tk_ * x_bytes            # x double buffer
            f += 3 * tk_ * tn_ * w_bytes            # weight stream (Buffered(3) worst case)
            f += 2 * tn_ * 4                        # bias (f32)
            f += 2 * tm_ * tn_ * o_bytes            # output double buffer
            if multi_k:
                f += tm_ * tn_ * 4                  # f32 accumulator scratch
            return f

        tk = tn = None
        for tk_c in tk_cands:                       # prefer fewest K steps (fewer acc RMWs)
            for tn_c in tn_cands:                   # then fewest N steps (x streamed once)
                if footprint(tm, tk_c, tn_c, tk_c < shard) <= budget:
                    tk, tn = tk_c, tn_c
                    break
            if tk is not None:
                break
        if tk is None:                              # tiny-budget fallback: smallest legal tiles
            tk, tn = tk_cands[-1], tn_cands[-1]

        assert B % tm == 0 and out_f % tn == 0 and shard % tk == 0, "tile must divide dim"
        m_tiles = B // tm
        n_tiles = out_f // tn
        k_tiles = shard // tk

        # v7x (2 TensorCores): avoid an odd, small parallel extent that would leave one
        # core idle; costs at most a handful of extra grid steps on 1-TC chips.
        if (m_tiles * n_tiles) % 2 == 1 and m_tiles * n_tiles > 1 and tn % 256 == 0:
            tn //= 2
            n_tiles *= 2

        # ---- index maps -----------------------------------------------------------
        k_off = rank * k_tiles if fold_split else 0

        def x_map(i, j, k):
            return (i, k_off + k)       # rank-shard selection folded into the K block index

        def w_map(i, j, k):
            return (k, j)

        def b_map(i, j, k):
            return (0, j)

        def o_map(i, j, k):
            return (i, j)

        # 3-deep weight stream when the weight block varies across grid steps (hides
        # HBM DMA latency gaps between k-steps in the weight-BW-bound decode regime).
        w_spec = pl.BlockSpec((tk, tn), w_map)
        if k_tiles * n_tiles > 1:
            try:
                w_spec = pl.BlockSpec((tk, tn), w_map, pipeline_mode=pl.Buffered(3))
            except TypeError:
                pass  # older jax without pipeline_mode: keep the default double buffer

        if k_tiles == 1:
            kernel = _tp_linear_kernel_single_k
            scratch = []
        else:
            kernel = _tp_linear_kernel_multi_k
            scratch = [pltpu.VMEM((tm, tn), jnp.float32)]

        return pl.pallas_call(
            kernel,
            out_shape=jax.ShapeDtypeStruct((B, out_f), x.dtype),
            grid_spec=pltpu.PrefetchScalarGridSpec(
                num_scalar_prefetch=0,
                grid=(m_tiles, n_tiles, k_tiles),
                in_specs=[
                    pl.BlockSpec((tm, tk), x_map),
                    w_spec,
                    pl.BlockSpec((1, tn), b_map),
                ],
                out_specs=pl.BlockSpec((tm, tn), o_map),
                scratch_shapes=scratch,
            ),
            compiler_params=pltpu.CompilerParams(
                dimension_semantics=("parallel", "parallel", "arbitrary"),
                vmem_limit_bytes=self.vmem_limit,
            ),
        )(x_in, self.weight_t, self.bias)


# --------------------------------------------------------------------------- demo
if __name__ == "__main__":
    # Small but non-trivial shapes consistent with the wrapped Linear module.
    B = 16            # batch
    HIDDEN = 2048     # full (unsharded) feature dim
    OUT = 768         # output features
    WORLD_SIZE = 2
    RANK = 1
    SHARD = HIDDEN // WORLD_SIZE

    key = jax.random.PRNGKey(0)
    kx, kw, kb = jax.random.split(key, 3)
    x = jax.random.normal(kx, (B, HIDDEN), dtype=jnp.float32)
    # Deterministic "Linear" params for the rank's shard (torch layout: (out, in)).
    weight = jax.random.normal(kw, (OUT, SHARD), dtype=jnp.float32) * 0.02
    bias = jax.random.normal(kb, (OUT,), dtype=jnp.float32) * 0.1

    # Pure-JAX reference of the exact wrapper semantics:
    #   split input along dim 1, take rank's chunk, linear, scale output.
    x_shard = x[:, RANK * SHARD:(RANK + 1) * SHARD]
    y_ref = (x_shard @ weight.T + bias) / WORLD_SIZE

    # 1) Exact-semantics path (f32 operands, f32 accumulation).  At this shape the
    #    tile picker collapses the grid to a single step (tk=SHARD, tn=OUT).
    tp_f32 = TensorParallelLinearWrapper(weight, bias, rank=RANK, world_size=WORLD_SIZE)
    y = jax.block_until_ready(tp_f32(x))
    assert y.shape == (B, OUT) and y.dtype == x.dtype
    assert jnp.allclose(y, y_ref, atol=1e-4, rtol=1e-4), "f32 path mismatch vs reference"

    # 2) bf16-weight fast path (half weight HBM bytes, MXU-rate matmul, f32 accumulation).
    tp_bf16 = TensorParallelLinearWrapper(
        weight, bias, rank=RANK, world_size=WORLD_SIZE, compute_dtype=jnp.bfloat16
    )
    y_fast = jax.block_until_ready(tp_bf16(x))
    assert y_fast.shape == (B, OUT)
    assert jnp.allclose(y_fast, y_ref, atol=5e-2, rtol=5e-2), "bf16 path mismatch vs reference"

    # 3) Force the tiled multi-K path (small artificial tile budget) to exercise the
    #    accumulator kernel, the Buffered(3) weight stream and the 2-TC balance logic.
    tp_tiled = TensorParallelLinearWrapper(
        weight, bias, rank=RANK, world_size=WORLD_SIZE,
        tile_vmem_budget_bytes=2 * 1024 * 1024,
    )
    y_tiled = jax.block_until_ready(tp_tiled(x))
    assert jnp.allclose(y_tiled, y_ref, atol=1e-4, rtol=1e-4), "tiled path mismatch vs reference"

    # TODO(synk): custom callable actions and multi-output dict/sequence actions of the
    # generic wrapper are host-side Python dispatch with no kernel-side equivalent.
    print("KERNEL_OK")
</pallas_src>

<mosaic_0001>
module attributes {stable_mosaic.version = 11 : i64} {
  func.func @_tp_linear_kernel_single_k(%arg0: i32, %arg1: i32, %arg2: i32, %arg3: memref<16x1024xf32, #tpu.memory_space<vmem>>, %arg4: memref<1024x768xf32, #tpu.memory_space<vmem>>, %arg5: memref<1x768xf32, #tpu.memory_space<vmem>>, %arg6: memref<16x768xf32, #tpu.memory_space<vmem>>) attributes {dimension_semantics = [#tpu.dimension_semantics<parallel>, #tpu.dimension_semantics<parallel>, #tpu.dimension_semantics<arbitrary>], iteration_bounds = array<i64: 1, 1, 1>, scalar_prefetch = 0 : i64, scratch_operands = 0 : i64, tpu.core_type = #tpu.core_type<tc>, window_params = [{transform_indices = @transform_0, window_bounds = array<i64: 16, 1024>}, {transform_indices = @transform_1, window_bounds = array<i64: 1024, 768>}, {transform_indices = @transform_2, window_bounds = array<i64: 1, 768>}, {transform_indices = @transform_3, window_bounds = array<i64: 16, 768>}]} {
    %c0 = arith.constant 0 : index
    %c0_0 = arith.constant 0 : index
    %0 = vector.load %arg3[%c0, %c0_0] : memref<16x1024xf32, #tpu.memory_space<vmem>>, vector<16x1024xf32>
    %c0_1 = arith.constant 0 : index
    %c0_2 = arith.constant 0 : index
    %1 = vector.load %arg4[%c0_1, %c0_2] : memref<1024x768xf32, #tpu.memory_space<vmem>>, vector<1024x768xf32>
    %cst = arith.constant dense<0.000000e+00> : vector<16x768xf32>
    %2 = tpu.matmul %0, %1, %cst {dimension_numbers = #tpu.dot_dimension_numbers<[1], [0], [0], [1], [0, 0, 1, 1], [], []>} : vector<16x1024xf32>, vector<1024x768xf32>, vector<16x768xf32> -> vector<16x768xf32>
    %c0_3 = arith.constant 0 : index
    %c0_4 = arith.constant 0 : index
    %3 = vector.load %arg5[%c0_3, %c0_4] : memref<1x768xf32, #tpu.memory_space<vmem>>, vector<1x768xf32>
    %4 = vector.broadcast %3 : vector<1x768xf32> to vector<16x768xf32>
    %5 = arith.addf %2, %4 : vector<16x768xf32>
    %c0_5 = arith.constant 0 : index
    %c0_6 = arith.constant 0 : index
    %6 = vector.load %arg6[%c0_5, %c0_6] : memref<16x768xf32, #tpu.memory_space<vmem>>, vector<16x768xf32>
    tpu.vector_store %arg6[%c0_5, %c0_6], %5 {strides = array<i32>} : memref<16x768xf32, #tpu.memory_space<vmem>>, vector<16x768xf32>,
    return
  }
  func.func @transform_0(%arg0: i32, %arg1: i32, %arg2: i32) -> (i32, i32) {
    %c1_i32 = arith.constant 1 : i32
    %0 = arith.addi %c1_i32, %arg2 : i32
    %c0_i32 = arith.constant 0 : i32
    return %arg0, %0 : i32, i32
  }
  func.func @transform_1(%arg0: i32, %arg1: i32, %arg2: i32) -> (i32, i32) {
    %c0_i32 = arith.constant 0 : i32
    return %arg2, %arg1 : i32, i32
  }
  func.func @transform_2(%arg0: i32, %arg1: i32, %arg2: i32) -> (i32, i32) {
    %c0_i32 = arith.constant 0 : i32
    %c0_i32_0 = arith.constant 0 : i32
    return %c0_i32, %arg1 : i32, i32
  }
  func.func @transform_3(%arg0: i32, %arg1: i32, %arg2: i32) -> (i32, i32) {
    %c0_i32 = arith.constant 0 : i32
    return %arg0, %arg1 : i32, i32
  }
}

</mosaic_0001>

<bundles_post_ra>
// kernel: tpu_custom_call.1
= control target key start
LH: loop header
LB: loop body
LE: loop exit
PB: predicated region body
PF: predicated region fallthrough
CT: control target
= control target key end

     0   :  { %8 = vsyncpa [#allocation3], 0  ;;  %s2024_s0 = inlined_call_operand.hbm [shape: f32[16,2048], index: 0, kind: input, shape index: {}]   ;;  %s2025_s1 = inlined_call_operand.hbm [shape: f32[1024,768], index: 1, kind: input, shape index: {}]   ;;  %s2026_s2 = inlined_call_operand.hbm [shape: f32[1,768], index: 2, kind: input, shape index: {}]   ;;  %s2027_s3 = inlined_call_operand.hbm [shape: f32[16,768], index: 3, kind: output, shape index: {}]  }
   0x1   :  { %9 = vsyncpa [#allocation6], 0 }
   0x2   :  { %10 = vsyncpa [#allocation4], 0  ;;  %s1961_s12 = smov [#allocation5]   ;;  %s1830_s16 = scalar_lea.hbm %s2024_s0, 1024 }
   0x3   :  { %s32_s13 = sshll.u32 %s1961_s12, 4  ;;  %s33_s13 = int_to_ptr.vmem [resolvable:$true] %s32_s13 }
   0x4   :  { %s1880_s17 = scalar_lea.vmem %s33_s13, 98304  ;;  %p1885_p1 = scmp.lt.s32.totalorder %s33_s13, %s33_s13 }
   0x5   :  { %p1881_p0 = scmp.ne.s32.totalorder %s33_s13, %s1880_s17  ;;  %p1886_p2 = scmp.lt.s32.totalorder %s1880_s17, %s1880_s17 }
   0x7   :  { %p1887_p3 = por %p1886_p2, %p1885_p1 }
   0x9   :  { %p1888_p4 = pnand %p1887_p3, %p1881_p0 }
   0xb   :  { %1891 = shalt.err (!%p1888_p4)
}
   0xc   :  { %s1962_s18 = smov 768   ;;  %s1963_s19 = smov 48  }
   0xd   :  { %38 = dma.hbm_to_vmem [thread:$0]  %s2025_s1, 98304, %s33_s13, [#allocation6], %s1962_s18, %s1962_s18, %s1963_s19  }
   0xe   :  { %s1964_s22 = smov [#allocation2]  }
   0xf   :  { %s20_s23 = sshll.u32 %s1964_s22, 4  ;;  %s21_s23 = int_to_ptr.vmem [resolvable:$true] %s20_s23 }
  0x10   :  { %s1902_s0 = scalar_lea.vmem %s21_s23, 2048  ;;  %p1907_p6 = scmp.lt.s32.totalorder %s21_s23, %s21_s23 }
  0x11   :  { %p1903_p5 = scmp.ne.s32.totalorder %s21_s23, %s1902_s0  ;;  %p1908_p7 = scmp.lt.s32.totalorder %s1902_s0, %s1902_s0 }
  0x13   :  { %p1909_p8 = por %p1908_p7, %p1907_p6 }
  0x15   :  { %p1910_p9 = pnand %p1909_p8, %p1903_p5 }
  0x17   :  { %1913 = shalt.err (!%p1910_p9)
}
  0x18   :  { %s1965_s24 = smov 2048   ;;  %s1966_s25 = smov 1024  }
  0x19   :  { %s1967_s26 = smov 64   ;;  %s1968_s27 = smov [#allocation7]  }
  0x1a   :  { %26 = dma.hbm_to_vmem [thread:$0]  %s1830_s16, 2048, %s21_s23, [#allocation3], %s1965_s24, %s1966_s25, %s1967_s26  }
  0x1b   :  { %s45_s28 = sshll.u32 %s1968_s27, 4  ;;  %s46_s28 = int_to_ptr.vmem [resolvable:$true] %s45_s28 }
  0x1c   :  { %s1923_s29 = scalar_lea.vmem %s46_s28, 96  ;;  %p1928_p11 = scmp.lt.s32.totalorder %s46_s28, %s46_s28 }
  0x1d   :  { %p1924_p10 = scmp.ne.s32.totalorder %s46_s28, %s1923_s29  ;;  %p1929_p12 = scmp.lt.s32.totalorder %s1923_s29, %s1923_s29 }
  0x1f   :  { %p1930_p13 = por %p1929_p12, %p1928_p11 }
  0x21   :  { %p1931_p0 = pnand %p1930_p13, %p1924_p10 }
  0x23   :  { %1934 = shalt.err (!%p1931_p0)
}
  0x24   :  { %48 = dma.hbm_to_vmem [thread:$0]  %s2026_s2, 96, %s46_s28, [#allocation6]  }
  0x25   :  { %1955 = dma.done.wait [#allocation3], 2048  }
  0x26   :  { %1956 = vsyncadd [#allocation3], 4294965248 }
  0x27   :  { %1957 = dma.done.wait [#allocation6], 98400  }
  0x28   :  { %1958 = vsyncadd [#allocation6], 4294868896  ;;  %v167_v0 = vld [vmem:[#allocation5 + $0x2d8] sm:$0xff]  ;;  %v166_v2 = vld [vmem:[#allocation5 + $0x2d0] sm:$0xff]  ;;  %s1969_s2 = smov [#allocation8]  }
  0x29   :  { %v359_v1 = vld [vmem:[#allocation5 + $0x8d8] sm:$0xff]  ;;  %876 = vmatprep.subr.mxu0 %v167_v0  ;;  %v358_v3 = vld [vmem:[#allocation5 + $0x8d0] sm:$0xff]  ;;  %v161_v4 = vld [vmem:[#allocation5 + $0x2a8] sm:$0xff]  ;;  %s1817_s4 = sshll.u32 %s1969_s2, 4  ;;  %s1818_s4 = int_to_ptr.vmem [resolvable:$true] %s1817_s4 }
  0x2a   :  { %953 = vmatprep.subr.mxu1 %v359_v1  ;;  %v353_v5 = vld [vmem:[#allocation5 + $0x8a8] sm:$0xff]  ;;  %877 = vmatpush1.msra.mxu0 %v166_v2  ;;  %v160_v6 = vld [vmem:[#allocation5 + $0x2a0] sm:$0xff]  ;;  %v155_v8 = vld [vmem:[#allocation5 + $0x278] sm:$0xff]  ;;  %s1935_s5 = scalar_lea.vmem %s1818_s4, 1536  ;;  %p1940_p2 = scmp.lt.s32.totalorder %s1818_s4, %s1818_s4 }
  0x2b   :  { %954 = vmatpush1.msra.mxu1 %v358_v3  ;;  %v352_v7 = vld [vmem:[#allocation5 + $0x8a0] sm:$0xff]  ;;  %878 = vmatprep.subr.mxu0 %v161_v4  ;;  %v347_v9 = vld [vmem:[#allocation5 + $0x878] sm:$0xff]  ;;  %v154_v10 = vld [vmem:[#allocation5 + $0x270] sm:$0xff]  ;;  %p1936_p1 = scmp.ne.s32.totalorder %s1818_s4, %s1935_s5  ;;  %p1941_p3 = scmp.lt.s32.totalorder %s1935_s5, %s1935_s5 }
  0x2c   :  { %955 = vmatprep.subr.mxu1 %v353_v5  ;;  %v346_v11 = vld [vmem:[#allocation5 + $0x870] sm:$0xff]  ;;  %879 = vmatpush1.msra.mxu0 %v160_v6  ;;  %v149_v12 = vld [vmem:[#allocation5 + $0x248] sm:$0xff]  ;;  %v148_v14 = vld [vmem:[#allocation5 + $0x240] sm:$0xff] }
  0x2d   :  { %956 = vmatpush1.msra.mxu1 %v352_v7  ;;  %v341_v13 = vld [vmem:[#allocation5 + $0x848] sm:$0xff]  ;;  %880 = vmatprep.subr.mxu0 %v155_v8  ;;  %v340_v15 = vld [vmem:[#allocation5 + $0x840] sm:$0xff]  ;;  %v143_v16 = vld [vmem:[#allocation5 + $0x218] sm:$0xff]  ;;  %p1942_p4 = por %p1941_p3, %p1940_p2 }
  0x2e   :  { %957 = vmatprep.subr.mxu1 %v347_v9  ;;  %881 = vmatpush1.msra.mxu0 %v154_v10  ;;  %v335_v17 = vld [vmem:[#allocation5 + $0x818] sm:$0xff]  ;;  %v142_v18 = vld [vmem:[#allocation5 + $0x210] sm:$0xff]  ;;  %v137_v20 = vld [vmem:[#allocation5 + $0x1e8] sm:$0xff] }
  0x2f   :  { %958 = vmatpush1.msra.mxu1 %v346_v11  ;;  %882 = vmatprep.subr.mxu0 %v149_v12  ;;  %v334_v19 = vld [vmem:[#allocation5 + $0x810] sm:$0xff]  ;;  %v329_v21 = vld [vmem:[#allocation5 + $0x7e8] sm:$0xff]  ;;  %v136_v22 = vld [vmem:[#allocation5 + $0x1e0] sm:$0xff]  ;;  %p1943_p5 = pnand %p1942_p4, %p1936_p1 }
  0x30   :  { %959 = vmatprep.subr.mxu1 %v341_v13  ;;  %883 = vmatpush1.msra.mxu0 %v148_v14  ;;  %v328_v23 = vld [vmem:[#allocation5 + $0x7e0] sm:$0xff]  ;;  %v131_v24 = vld [vmem:[#allocation5 + $0x1b8] sm:$0xff]  ;;  %v130_v26 = vld [vmem:[#allocation5 + $0x1b0] sm:$0xff] }
  0x31   :  { %960 = vmatpush1.msra.mxu1 %v340_v15  ;;  %884 = vmatprep.subr.mxu0 %v143_v16  ;;  %v323_v25 = vld [vmem:[#allocation5 + $0x7b8] sm:$0xff]  ;;  %v322_v27 = vld [vmem:[#allocation5 + $0x7b0] sm:$0xff]  ;;  %v125_v28 = vld [vmem:[#allocation5 + $0x188] sm:$0xff] }
  0x32   :  { %961 = vmatprep.subr.mxu1 %v335_v17  ;;  %885 = vmatpush1.msra.mxu0 %v142_v18  ;;  %v317_v29 = vld [vmem:[#allocation5 + $0x788] sm:$0xff]  ;;  %v124_v30 = vld [vmem:[#allocation5 + $0x180] sm:$0xff]  ;;  %v119_v32 = vld [vmem:[#allocation5 + $0x158] sm:$0xff] }
  0x33   :  { %962 = vmatpush1.msra.mxu1 %v334_v19  ;;  %886 = vmatprep.subr.mxu0 %v137_v20  ;;  %v316_v31 = vld [vmem:[#allocation5 + $0x780] sm:$0xff]  ;;  %v311_v33 = vld [vmem:[#allocation5 + $0x758] sm:$0xff]  ;;  %v118_v34 = vld [vmem:[#allocation5 + $0x150] sm:$0xff] }
  0x34   :  { %963 = vmatprep.subr.mxu1 %v329_v21  ;;  %887 = vmatpush1.msra.mxu0 %v136_v22  ;;  %v310_v35 = vld [vmem:[#allocation5 + $0x750] sm:$0xff]  ;;  %v113_v36 = vld [vmem:[#allocation5 + $0x128] sm:$0xff]  ;;  %v112_v38 = vld [vmem:[#allocation5 + $0x120] sm:$0xff] }
  0x35   :  { %964 = vmatpush1.msra.mxu1 %v328_v23  ;;  %888 = vmatprep.subr.mxu0 %v131_v24  ;;  %v305_v37 = vld [vmem:[#allocation5 + $0x728] sm:$0xff]  ;;  %v304_v39 = vld [vmem:[#allocation5 + $0x720] sm:$0xff]  ;;  %v107_v40 = vld [vmem:[#allocation5 + $0xf8] sm:$0xff] }
  0x36   :  { %965 = vmatprep.subr.mxu1 %v323_v25  ;;  %889 = vmatpush1.msra.mxu0 %v130_v26  ;;  %v299_v41 = vld [vmem:[#allocation5 + $0x6f8] sm:$0xff]  ;;  %v106_v42 = vld [vmem:[#allocation5 + $0xf0] sm:$0xff]  ;;  %v101_v44 = vld [vmem:[#allocation5 + $0xc8] sm:$0xff] }
  0x37   :  { %966 = vmatpush1.msra.mxu1 %v322_v27  ;;  %890 = vmatprep.subr.mxu0 %v125_v28  ;;  %v298_v43 = vld [vmem:[#allocation5 + $0x6f0] sm:$0xff]  ;;  %v293_v45 = vld [vmem:[#allocation5 + $0x6c8] sm:$0xff]  ;;  %v100_v46 = vld [vmem:[#allocation5 + $0xc0] sm:$0xff] }
  0x38   :  { %967 = vmatprep.subr.mxu1 %v317_v29  ;;  %891 = vmatpush1.msra.mxu0 %v124_v30  ;;  %v292_v47 = vld [vmem:[#allocation5 + $0x6c0] sm:$0xff]  ;;  %v95_v48 = vld [vmem:[#allocation5 + $0x98] sm:$0xff]  ;;  %v94_v50 = vld [vmem:[#allocation5 + $0x90] sm:$0xff] }
  0x39   :  { %968 = vmatpush1.msra.mxu1 %v316_v31  ;;  %892 = vmatprep.subr.mxu0 %v119_v32  ;;  %v287_v49 = vld [vmem:[#allocation5 + $0x698] sm:$0xff]  ;;  %v286_v51 = vld [vmem:[#allocation5 + $0x690] sm:$0xff]  ;;  %v89_v52 = vld [vmem:[#allocation5 + $0x68] sm:$0xff] }
  0x3a   :  { %969 = vmatprep.subr.mxu1 %v311_v33  ;;  %893 = vmatpush1.msra.mxu0 %v118_v34  ;;  %v281_v53 = vld [vmem:[#allocation5 + $0x668] sm:$0xff]  ;;  %v88_v54 = vld [vmem:[#allocation5 + $0x60] sm:$0xff]  ;;  %v83_v56 = vld [vmem:[#allocation5 + $0x38] sm:$0xff] }
  0x3b   :  { %970 = vmatpush1.msra.mxu1 %v310_v35  ;;  %894 = vmatprep.subr.mxu0 %v113_v36  ;;  %v280_v55 = vld [vmem:[#allocation5 + $0x660] sm:$0xff]  ;;  %v275_v57 = vld [vmem:[#allocation5 + $0x638] sm:$0xff]  ;;  %v82_v58 = vld [vmem:[#allocation5 + $0x30] sm:$0xff] }
  0x3c   :  { %971 = vmatprep.subr.mxu1 %v305_v37  ;;  %895 = vmatpush1.msra.mxu0 %v112_v38  ;;  %v274_v59 = vld [vmem:[#allocation5 + $0x630] sm:$0xff]  ;;  %v77_v60 = vld [vmem:[#allocation5 + $0x8] sm:$0xff]  ;;  %v76_v62 = vld [vmem:[#allocation5] sm:$0xff] }
  0x3d   :  { %972 = vmatpush1.msra.mxu1 %v304_v39  ;;  %896 = vmatprep.subr.mxu0 %v107_v40  ;;  %v269_v61 = vld [vmem:[#allocation5 + $0x608] sm:$0xff]  ;;  %v268_v63 = vld [vmem:[#allocation5 + $0x600] sm:$0xff]  ;;  %v263_v0 = vld [vmem:[#allocation5 + $0x5d8] sm:$0xff] }
  0x3e   :  { %973 = vmatprep.subr.mxu1 %v299_v41  ;;  %897 = vmatpush1.msra.mxu0 %v106_v42  ;;  %v455_v1 = vld [vmem:[#allocation5 + $0xbd8] sm:$0xff]  ;;  %v262_v2 = vld [vmem:[#allocation5 + $0x5d0] sm:$0xff]  ;;  %v257_v4 = vld [vmem:[#allocation5 + $0x5a8] sm:$0xff] }
  0x3f   :  { %974 = vmatpush1.msra.mxu1 %v298_v43  ;;  %898 = vmatprep.subr.mxu0 %v101_v44  ;;  %v454_v3 = vld [vmem:[#allocation5 + $0xbd0] sm:$0xff]  ;;  %v449_v5 = vld [vmem:[#allocation5 + $0xba8] sm:$0xff]  ;;  %v256_v6 = vld [vmem:[#allocation5 + $0x5a0] sm:$0xff] }
  0x40   :  { %975 = vmatprep.subr.mxu1 %v293_v45  ;;  %899 = vmatpush1.msra.mxu0 %v100_v46  ;;  %v448_v7 = vld [vmem:[#allocation5 + $0xba0] sm:$0xff]  ;;  %v251_v8 = vld [vmem:[#allocation5 + $0x578] sm:$0xff]  ;;  %v250_v10 = vld [vmem:[#allocation5 + $0x570] sm:$0xff] }
  0x41   :  { %976 = vmatpush1.msra.mxu1 %v292_v47  ;;  %900 = vmatprep.subr.mxu0 %v95_v48  ;;  %v443_v9 = vld [vmem:[#allocation5 + $0xb78] sm:$0xff]  ;;  %v442_v11 = vld [vmem:[#allocation5 + $0xb70] sm:$0xff]  ;;  %v245_v12 = vld [vmem:[#allocation5 + $0x548] sm:$0xff] }
  0x42   :  { %977 = vmatprep.subr.mxu1 %v287_v49  ;;  %901 = vmatpush1.msra.mxu0 %v94_v50  ;;  %v437_v13 = vld [vmem:[#allocation5 + $0xb48] sm:$0xff]  ;;  %v244_v14 = vld [vmem:[#allocation5 + $0x540] sm:$0xff]  ;;  %v239_v16 = vld [vmem:[#allocation5 + $0x518] sm:$0xff] }
  0x43   :  { %978 = vmatpush1.msra.mxu1 %v286_v51  ;;  %902 = vmatprep.subr.mxu0 %v89_v52  ;;  %v436_v15 = vld [vmem:[#allocation5 + $0xb40] sm:$0xff]  ;;  %v431_v17 = vld [vmem:[#allocation5 + $0xb18] sm:$0xff]  ;;  %v238_v18 = vld [vmem:[#allocation5 + $0x510] sm:$0xff] }
  0x44   :  { %979 = vmatprep.subr.mxu1 %v281_v53  ;;  %903 = vmatpush1.msra.mxu0 %v88_v54  ;;  %v430_v19 = vld [vmem:[#allocation5 + $0xb10] sm:$0xff]  ;;  %v233_v20 = vld [vmem:[#allocation5 + $0x4e8] sm:$0xff]  ;;  %v232_v22 = vld [vmem:[#allocation5 + $0x4e0] sm:$0xff] }
  0x45   :  { %980 = vmatpush1.msra.mxu1 %v280_v55  ;;  %904 = vmatprep.subr.mxu0 %v83_v56  ;;  %v425_v21 = vld [vmem:[#allocation5 + $0xae8] sm:$0xff]  ;;  %v424_v23 = vld [vmem:[#allocation5 + $0xae0] sm:$0xff]  ;;  %v227_v24 = vld [vmem:[#allocation5 + $0x4b8] sm:$0xff] }
  0x46   :  { %981 = vmatprep.subr.mxu1 %v275_v57  ;;  %905 = vmatpush1.msra.mxu0 %v82_v58  ;;  %v419_v25 = vld [vmem:[#allocation5 + $0xab8] sm:$0xff]  ;;  %v226_v26 = vld [vmem:[#allocation5 + $0x4b0] sm:$0xff]  ;;  %v221_v28 = vld [vmem:[#allocation5 + $0x488] sm:$0xff] }
  0x47   :  { %982 = vmatpush1.msra.mxu1 %v274_v59  ;;  %906 = vmatprep.subr.mxu0 %v77_v60  ;;  %v418_v27 = vld [vmem:[#allocation5 + $0xab0] sm:$0xff]  ;;  %v413_v29 = vld [vmem:[#allocation5 + $0xa88] sm:$0xff]  ;;  %v220_v30 = vld [vmem:[#allocation5 + $0x480] sm:$0xff] }
  0x48   :  { %983 = vmatprep.subr.mxu1 %v269_v61  ;;  %907 = vmatpush1.msra.mxu0 %v76_v62  ;;  %v412_v31 = vld [vmem:[#allocation5 + $0xa80] sm:$0xff]  ;;  %v215_v32 = vld [vmem:[#allocation5 + $0x458] sm:$0xff]  ;;  %v214_v34 = vld [vmem:[#allocation5 + $0x450] sm:$0xff] }
  0x49   :  { %984 = vmatpush1.msra.mxu1 %v268_v63  ;;  %908 = vmatprep.subr.mxu0 %v263_v0  ;;  %v407_v33 = vld [vmem:[#allocation5 + $0xa58] sm:$0xff]  ;;  %v406_v35 = vld [vmem:[#allocation5 + $0xa50] sm:$0xff]  ;;  %v209_v36 = vld [vmem:[#allocation5 + $0x428] sm:$0xff] }
  0x4a   :  { %985 = vmatprep.subr.mxu1 %v455_v1  ;;  %909 = vmatpush2.msra.mxu0 %v262_v2  ;;  %v401_v37 = vld [vmem:[#allocation5 + $0xa28] sm:$0xff]  ;;  %v208_v38 = vld [vmem:[#allocation5 + $0x420] sm:$0xff]  ;;  %v203_v40 = vld [vmem:[#allocation5 + $0x3f8] sm:$0xff] }
  0x4b   :  { %986 = vmatpush2.msra.mxu1 %v454_v3  ;;  %910 = vmatprep.subr.mxu0 %v257_v4  ;;  %v400_v39 = vld [vmem:[#allocation5 + $0xa20] sm:$0xff]  ;;  %v395_v41 = vld [vmem:[#allocation5 + $0x9f8] sm:$0xff]  ;;  %v202_v42 = vld [vmem:[#allocation5 + $0x3f0] sm:$0xff] }
  0x4c   :  { %987 = vmatprep.subr.mxu1 %v449_v5  ;;  %911 = vmatpush2.msra.mxu0 %v256_v6  ;;  %v394_v43 = vld [vmem:[#allocation5 + $0x9f0] sm:$0xff]  ;;  %v197_v44 = vld [vmem:[#allocation5 + $0x3c8] sm:$0xff]  ;;  %v196_v46 = vld [vmem:[#allocation5 + $0x3c0] sm:$0xff] }
  0x4d   :  { %988 = vmatpush2.msra.mxu1 %v448_v7  ;;  %912 = vmatprep.subr.mxu0 %v251_v8  ;;  %v389_v45 = vld [vmem:[#allocation5 + $0x9c8] sm:$0xff]  ;;  %v388_v47 = vld [vmem:[#allocation5 + $0x9c0] sm:$0xff]  ;;  %v191_v48 = vld [vmem:[#allocation5 + $0x398] sm:$0xff] }
  0x4e   :  { %989 = vmatprep.subr.mxu1 %v443_v9  ;;  %913 = vmatpush2.msra.mxu0 %v250_v10  ;;  %v383_v49 = vld [vmem:[#allocation5 + $0x998] sm:$0xff]  ;;  %v190_v50 = vld [vmem:[#allocation5 + $0x390] sm:$0xff]  ;;  %v185_v52 = vld [vmem:[#allocation5 + $0x368] sm:$0xff] }
  0x4f   :  { %990 = vmatpush2.msra.mxu1 %v442_v11  ;;  %914 = vmatprep.subr.mxu0 %v245_v12  ;;  %v382_v51 = vld [vmem:[#allocation5 + $0x990] sm:$0xff]  ;;  %v377_v53 = vld [vmem:[#allocation5 + $0x968] sm:$0xff]  ;;  %v184_v54 = vld [vmem:[#allocation5 + $0x360] sm:$0xff] }
  0x50   :  { %991 = vmatprep.subr.mxu1 %v437_v13  ;;  %915 = vmatpush2.msra.mxu0 %v244_v14  ;;  %v376_v55 = vld [vmem:[#allocation5 + $0x960] sm:$0xff]  ;;  %v179_v56 = vld [vmem:[#allocation5 + $0x338] sm:$0xff]  ;;  %v178_v58 = vld [vmem:[#allocation5 + $0x330] sm:$0xff] }
  0x51   :  { %992 = vmatpush2.msra.mxu1 %v436_v15  ;;  %916 = vmatprep.subr.mxu0 %v239_v16  ;;  %v371_v57 = vld [vmem:[#allocation5 + $0x938] sm:$0xff]  ;;  %v370_v59 = vld [vmem:[#allocation5 + $0x930] sm:$0xff]  ;;  %v173_v60 = vld [vmem:[#allocation5 + $0x308] sm:$0xff] }
  0x52   :  { %993 = vmatprep.subr.mxu1 %v431_v17  ;;  %917 = vmatpush2.msra.mxu0 %v238_v18  ;;  %v365_v61 = vld [vmem:[#allocation5 + $0x908] sm:$0xff]  ;;  %v172_v62 = vld [vmem:[#allocation5 + $0x300] sm:$0xff]  ;;  %v63_v2 = vld [vmem:[#allocation2 + $0x18] sm:$0xff] }
  0x53   :  { %994 = vmatpush2.msra.mxu1 %v430_v19  ;;  %918 = vmatprep.subr.mxu0 %v233_v20  ;;  %v61_v63 = vld [vmem:[#allocation2 + $0x8] sm:$0xff]  ;;  %v364_v0 = vld [vmem:[#allocation5 + $0x900] sm:$0xff]  ;;  %v551_v3 = vld [vmem:[#allocation5 + $0xed8] sm:$0xff] }
  0x54   :  { %995 = vmatprep.subr.mxu1 %v425_v21  ;;  %919 = vmatpush2.msra.mxu0 %v232_v22  ;;  %v60_v1 = vld [vmem:[#allocation2] sm:$0xff]  ;;  %v743_v4 = vld [vmem:[#allocation5 + $0x14d8] sm:$0xff]  ;;  %v62_v5 = vld [vmem:[#allocation2 + $0x10] sm:$0xff] }
  0x55   :  { %996 = vmatpush2.msra.mxu1 %v424_v23  ;;  %920 = vmatprep.subr.mxu0 %v227_v24  ;;  %v550_v6 = vld [vmem:[#allocation5 + $0xed0] sm:$0xff]  ;;  %v545_v8 = vld [vmem:[#allocation5 + $0xea8] sm:$0xff]  ;;  %v544_v10 = vld [vmem:[#allocation5 + $0xea0] sm:$0xff] }
  0x56   :  { %997 = vmatprep.subr.mxu1 %v419_v25  ;;  %921 = vmatpush2.msra.mxu0 %v226_v26  ;;  %v742_v7 = vld [vmem:[#allocation5 + $0x14d0] sm:$0xff]  ;;  %v737_v9 = vld [vmem:[#allocation5 + $0x14a8] sm:$0xff]  ;;  %v736_v11 = vld [vmem:[#allocation5 + $0x14a0] sm:$0xff] }
  0x57   :  { %998 = vmatpush2.msra.mxu1 %v418_v27  ;;  %922 = vmatprep.subr.mxu0 %v221_v28  ;;  %v539_v12 = vld [vmem:[#allocation5 + $0xe78] sm:$0xff]  ;;  %v538_v14 = vld [vmem:[#allocation5 + $0xe70] sm:$0xff]  ;;  %v533_v16 = vld [vmem:[#allocation5 + $0xe48] sm:$0xff] }
  0x58   :  { %999 = vmatprep.subr.mxu1 %v413_v29  ;;  %923 = vmatpush2.msra.mxu0 %v220_v30  ;;  %v731_v13 = vld [vmem:[#allocation5 + $0x1478] sm:$0xff]  ;;  %v730_v15 = vld [vmem:[#allocation5 + $0x1470] sm:$0xff]  ;;  %v725_v17 = vld [vmem:[#allocation5 + $0x1448] sm:$0xff] }
  0x59   :  { %1000 = vmatpush2.msra.mxu1 %v412_v31  ;;  %924 = vmatprep.subr.mxu0 %v215_v32  ;;  %v532_v18 = vld [vmem:[#allocation5 + $0xe40] sm:$0xff]  ;;  %v527_v20 = vld [vmem:[#allocation5 + $0xe18] sm:$0xff]  ;;  %v526_v22 = vld [vmem:[#allocation5 + $0xe10] sm:$0xff] }
  0x5a   :  { %1001 = vmatprep.subr.mxu1 %v407_v33  ;;  %925 = vmatpush2.msra.mxu0 %v214_v34  ;;  %v724_v19 = vld [vmem:[#allocation5 + $0x1440] sm:$0xff]  ;;  %v719_v21 = vld [vmem:[#allocation5 + $0x1418] sm:$0xff]  ;;  %v718_v23 = vld [vmem:[#allocation5 + $0x1410] sm:$0xff] }
  0x5b   :  { %1002 = vmatpush2.msra.mxu1 %v406_v35  ;;  %926 = vmatprep.subr.mxu0 %v209_v36  ;;  %v521_v24 = vld [vmem:[#allocation5 + $0xde8] sm:$0xff]  ;;  %v520_v26 = vld [vmem:[#allocation5 + $0xde0] sm:$0xff]  ;;  %v515_v28 = vld [vmem:[#allocation5 + $0xdb8] sm:$0xff] }
  0x5c   :  { %1003 = vmatprep.subr.mxu1 %v401_v37  ;;  %927 = vmatpush2.msra.mxu0 %v208_v38  ;;  %v713_v25 = vld [vmem:[#allocation5 + $0x13e8] sm:$0xff]  ;;  %v712_v27 = vld [vmem:[#allocation5 + $0x13e0] sm:$0xff]  ;;  %v707_v29 = vld [vmem:[#allocation5 + $0x13b8] sm:$0xff] }
  0x5d   :  { %1004 = vmatpush2.msra.mxu1 %v400_v39  ;;  %928 = vmatprep.subr.mxu0 %v203_v40  ;;  %v514_v30 = vld [vmem:[#allocation5 + $0xdb0] sm:$0xff]  ;;  %v509_v32 = vld [vmem:[#allocation5 + $0xd88] sm:$0xff]  ;;  %v508_v34 = vld [vmem:[#allocation5 + $0xd80] sm:$0xff] }
  0x5e   :  { %1005 = vmatprep.subr.mxu1 %v395_v41  ;;  %929 = vmatpush2.msra.mxu0 %v202_v42  ;;  %v706_v31 = vld [vmem:[#allocation5 + $0x13b0] sm:$0xff]  ;;  %v701_v33 = vld [vmem:[#allocation5 + $0x1388] sm:$0xff]  ;;  %v700_v35 = vld [vmem:[#allocation5 + $0x1380] sm:$0xff] }
  0x5f   :  { %1006 = vmatpush2.msra.mxu1 %v394_v43  ;;  %930 = vmatprep.subr.mxu0 %v197_v44  ;;  %v503_v36 = vld [vmem:[#allocation5 + $0xd58] sm:$0xff]  ;;  %v502_v38 = vld [vmem:[#allocation5 + $0xd50] sm:$0xff]  ;;  %v497_v40 = vld [vmem:[#allocation5 + $0xd28] sm:$0xff] }
  0x60   :  { %1007 = vmatprep.subr.mxu1 %v389_v45  ;;  %931 = vmatpush2.msra.mxu0 %v196_v46  ;;  %v695_v37 = vld [vmem:[#allocation5 + $0x1358] sm:$0xff]  ;;  %v694_v39 = vld [vmem:[#allocation5 + $0x1350] sm:$0xff]  ;;  %v689_v41 = vld [vmem:[#allocation5 + $0x1328] sm:$0xff] }
  0x61   :  { %1008 = vmatpush2.msra.mxu1 %v388_v47  ;;  %932 = vmatprep.subr.mxu0 %v191_v48  ;;  %v496_v42 = vld [vmem:[#allocation5 + $0xd20] sm:$0xff]  ;;  %v491_v44 = vld [vmem:[#allocation5 + $0xcf8] sm:$0xff]  ;;  %v490_v46 = vld [vmem:[#allocation5 + $0xcf0] sm:$0xff] }
  0x62   :  { %1009 = vmatprep.subr.mxu1 %v383_v49  ;;  %933 = vmatpush2.msra.mxu0 %v190_v50  ;;  %v688_v43 = vld [vmem:[#allocation5 + $0x1320] sm:$0xff]  ;;  %v683_v45 = vld [vmem:[#allocation5 + $0x12f8] sm:$0xff]  ;;  %v682_v47 = vld [vmem:[#allocation5 + $0x12f0] sm:$0xff] }
  0x63   :  { %1010 = vmatpush2.msra.mxu1 %v382_v51  ;;  %934 = vmatprep.subr.mxu0 %v185_v52  ;;  %v485_v48 = vld [vmem:[#allocation5 + $0xcc8] sm:$0xff]  ;;  %v484_v50 = vld [vmem:[#allocation5 + $0xcc0] sm:$0xff]  ;;  %v479_v52 = vld [vmem:[#allocation5 + $0xc98] sm:$0xff] }
  0x64   :  { %1011 = vmatprep.subr.mxu1 %v377_v53  ;;  %935 = vmatpush2.msra.mxu0 %v184_v54  ;;  %v677_v49 = vld [vmem:[#allocation5 + $0x12c8] sm:$0xff]  ;;  %v676_v51 = vld [vmem:[#allocation5 + $0x12c0] sm:$0xff]  ;;  %v671_v53 = vld [vmem:[#allocation5 + $0x1298] sm:$0xff] }
  0x65   :  { %1012 = vmatpush2.msra.mxu1 %v376_v55  ;;  %936 = vmatprep.subr.mxu0 %v179_v56  ;;  %v478_v54 = vld [vmem:[#allocation5 + $0xc90] sm:$0xff]  ;;  %v473_v56 = vld [vmem:[#allocation5 + $0xc68] sm:$0xff] }
  0x66   :  { %1013 = vmatprep.subr.mxu1 %v371_v57  ;;  %937 = vmatpush2.msra.mxu0 %v178_v58  ;;  %v670_v55 = vld [vmem:[#allocation5 + $0x1290] sm:$0xff]  ;;  %v665_v57 = vld [vmem:[#allocation5 + $0x1268] sm:$0xff]  ;;  %v472_v58 = vld [vmem:[#allocation5 + $0xc60] sm:$0xff] }
  0x67   :  { %1014 = vmatpush2.msra.mxu1 %v370_v59  ;;  %938 = vmatprep.subr.mxu0 %v173_v60  ;;  %v664_v59 = vld [vmem:[#allocation5 + $0x1260] sm:$0xff]  ;;  %v467_v60 = vld [vmem:[#allocation5 + $0xc38] sm:$0xff] }
  0x68   :  { %1015 = vmatprep.subr.mxu1 %v365_v61  ;;  %939 = vmatpush2.msra.mxu0 %v172_v62  ;;  %v659_v61 = vld [vmem:[#allocation5 + $0x1238] sm:$0xff]  ;;  %v466_v62 = vld [vmem:[#allocation5 + $0xc30] sm:$0xff] }
  0x69   :  { %940 = vmatprep.mubr.f32.mxu0 %v61_v63  ;;  %1016 = vmatpush2.msra.mxu1 %v364_v0  ;;  %v658_v63 = vld [vmem:[#allocation5 + $0x1230] sm:$0xff]  ;;  %v461_v0 = vld [vmem:[#allocation5 + $0xc08] sm:$0xff] }
  0x6a   :  { %941 = vmatmul.mubr.f32.vlgmr.msra.gmra.mxu0 %v60_v1  ;;  %1017 = vmatprep.mubr.f32.mxu1 %v63_v2  ;;  %v653_v1 = vld [vmem:[#allocation5 + $0x1208] sm:$0xff]  ;;  %v460_v2 = vld [vmem:[#allocation5 + $0xc00] sm:$0xff] }
  0x6b   :  { %1030 = vmatprep.subr.mxu0 %v551_v3  ;;  %1107 = vmatprep.subr.mxu1 %v743_v4  ;;  %v652_v3 = vld [vmem:[#allocation5 + $0x1200] sm:$0xff]  ;;  %v647_v4 = vld [vmem:[#allocation5 + $0x11d8] sm:$0xff] }
  0x6c   :  { %1018 = vmatmul.mubr.f32.vlgmr.msra.gmra.mxu1 %v62_v5  ;;  %1031 = vmatpush1.msra.mxu0 %v550_v6  ;;  %v839_v5 = vld [vmem:[#allocation5 + $0x17d8] sm:$0xff]  ;;  %v646_v6 = vld [vmem:[#allocation5 + $0x11d0] sm:$0xff] }
  0x6d   :  { %1108 = vmatpush1.msra.mxu1 %v742_v7  ;;  %1032 = vmatprep.subr.mxu0 %v545_v8  ;;  %v838_v7 = vld [vmem:[#allocation5 + $0x17d0] sm:$0xff]  ;;  %v641_v8 = vld [vmem:[#allocation5 + $0x11a8] sm:$0xff] }
  0x6e   :  { %1109 = vmatprep.subr.mxu1 %v737_v9  ;;  %1033 = vmatpush1.msra.mxu0 %v544_v10  ;;  %v833_v9 = vld [vmem:[#allocation5 + $0x17a8] sm:$0xff]  ;;  %v640_v10 = vld [vmem:[#allocation5 + $0x11a0] sm:$0xff] }
  0x6f   :  { %1110 = vmatpush1.msra.mxu1 %v736_v11  ;;  %1034 = vmatprep.subr.mxu0 %v539_v12  ;;  %v832_v11 = vld [vmem:[#allocation5 + $0x17a0] sm:$0xff]  ;;  %v635_v12 = vld [vmem:[#allocation5 + $0x1178] sm:$0xff] }
  0x70   :  { %1111 = vmatprep.subr.mxu1 %v731_v13  ;;  %1035 = vmatpush1.msra.mxu0 %v538_v14  ;;  %v827_v13 = vld [vmem:[#allocation5 + $0x1778] sm:$0xff]  ;;  %v634_v14 = vld [vmem:[#allocation5 + $0x1170] sm:$0xff] }
  0x71   :  { %1112 = vmatpush1.msra.mxu1 %v730_v15  ;;  %1036 = vmatprep.subr.mxu0 %v533_v16  ;;  %v826_v15 = vld [vmem:[#allocation5 + $0x1770] sm:$0xff]  ;;  %v629_v16 = vld [vmem:[#allocation5 + $0x1148] sm:$0xff] }
  0x72   :  { %1113 = vmatprep.subr.mxu1 %v725_v17  ;;  %1037 = vmatpush1.msra.mxu0 %v532_v18  ;;  %v821_v17 = vld [vmem:[#allocation5 + $0x1748] sm:$0xff]  ;;  %v628_v18 = vld [vmem:[#allocation5 + $0x1140] sm:$0xff] }
  0x73   :  { %1114 = vmatpush1.msra.mxu1 %v724_v19  ;;  %1038 = vmatprep.subr.mxu0 %v527_v20  ;;  %v820_v19 = vld [vmem:[#allocation5 + $0x1740] sm:$0xff]  ;;  %v623_v20 = vld [vmem:[#allocation5 + $0x1118] sm:$0xff] }
  0x74   :  { %1115 = vmatprep.subr.mxu1 %v719_v21  ;;  %1039 = vmatpush1.msra.mxu0 %v526_v22  ;;  %v815_v21 = vld [vmem:[#allocation5 + $0x1718] sm:$0xff]  ;;  %v622_v22 = vld [vmem:[#allocation5 + $0x1110] sm:$0xff] }
  0x75   :  { %1116 = vmatpush1.msra.mxu1 %v718_v23  ;;  %1040 = vmatprep.subr.mxu0 %v521_v24  ;;  %v814_v23 = vld [vmem:[#allocation5 + $0x1710] sm:$0xff]  ;;  %v617_v24 = vld [vmem:[#allocation5 + $0x10e8] sm:$0xff] }
  0x76   :  { %1117 = vmatprep.subr.mxu1 %v713_v25  ;;  %1041 = vmatpush1.msra.mxu0 %v520_v26  ;;  %v809_v25 = vld [vmem:[#allocation5 + $0x16e8] sm:$0xff]  ;;  %v616_v26 = vld [vmem:[#allocation5 + $0x10e0] sm:$0xff] }
  0x77   :  { %1118 = vmatpush1.msra.mxu1 %v712_v27  ;;  %1042 = vmatprep.subr.mxu0 %v515_v28  ;;  %v808_v27 = vld [vmem:[#allocation5 + $0x16e0] sm:$0xff]  ;;  %v611_v28 = vld [vmem:[#allocation5 + $0x10b8] sm:$0xff] }
  0x78   :  { %1119 = vmatprep.subr.mxu1 %v707_v29  ;;  %1043 = vmatpush1.msra.mxu0 %v514_v30  ;;  %v803_v29 = vld [vmem:[#allocation5 + $0x16b8] sm:$0xff]  ;;  %v610_v30 = vld [vmem:[#allocation5 + $0x10b0] sm:$0xff] }
  0x79   :  { %1120 = vmatpush1.msra.mxu1 %v706_v31  ;;  %1044 = vmatprep.subr.mxu0 %v509_v32  ;;  %v802_v31 = vld [vmem:[#allocation5 + $0x16b0] sm:$0xff]  ;;  %v605_v32 = vld [vmem:[#allocation5 + $0x1088] sm:$0xff] }
  0x7a   :  { %1121 = vmatprep.subr.mxu1 %v701_v33  ;;  %1045 = vmatpush1.msra.mxu0 %v508_v34  ;;  %v797_v33 = vld [vmem:[#allocation5 + $0x1688] sm:$0xff]  ;;  %v604_v34 = vld [vmem:[#allocation5 + $0x1080] sm:$0xff] }
  0x7b   :  { %1122 = vmatpush1.msra.mxu1 %v700_v35  ;;  %1046 = vmatprep.subr.mxu0 %v503_v36  ;;  %v796_v35 = vld [vmem:[#allocation5 + $0x1680] sm:$0xff]  ;;  %v599_v36 = vld [vmem:[#allocation5 + $0x1058] sm:$0xff] }
  0x7c   :  { %1123 = vmatprep.subr.mxu1 %v695_v37  ;;  %1047 = vmatpush1.msra.mxu0 %v502_v38  ;;  %v791_v37 = vld [vmem:[#allocation5 + $0x1658] sm:$0xff]  ;;  %v598_v38 = vld [vmem:[#allocation5 + $0x1050] sm:$0xff] }
  0x7d   :  { %1124 = vmatpush1.msra.mxu1 %v694_v39  ;;  %1048 = vmatprep.subr.mxu0 %v497_v40  ;;  %v790_v39 = vld [vmem:[#allocation5 + $0x1650] sm:$0xff]  ;;  %v593_v40 = vld [vmem:[#allocation5 + $0x1028] sm:$0xff] }
  0x7e   :  { %1125 = vmatprep.subr.mxu1 %v689_v41  ;;  %1049 = vmatpush1.msra.mxu0 %v496_v42  ;;  %v785_v41 = vld [vmem:[#allocation5 + $0x1628] sm:$0xff]  ;;  %v592_v42 = vld [vmem:[#allocation5 + $0x1020] sm:$0xff] }
  0x7f   :  { %1126 = vmatpush1.msra.mxu1 %v688_v43  ;;  %1050 = vmatprep.subr.mxu0 %v491_v44  ;;  %v784_v43 = vld [vmem:[#allocation5 + $0x1620] sm:$0xff]  ;;  %v587_v44 = vld [vmem:[#allocation5 + $0xff8] sm:$0xff] }
  0x80   :  { %1127 = vmatprep.subr.mxu1 %v683_v45  ;;  %1051 = vmatpush1.msra.mxu0 %v490_v46  ;;  %v779_v45 = vld [vmem:[#allocation5 + $0x15f8] sm:$0xff]  ;;  %v586_v46 = vld [vmem:[#allocation5 + $0xff0] sm:$0xff] }
  0x81   :  { %1128 = vmatpush1.msra.mxu1 %v682_v47  ;;  %1052 = vmatprep.subr.mxu0 %v485_v48  ;;  %v778_v47 = vld [vmem:[#allocation5 + $0x15f0] sm:$0xff]  ;;  %v581_v48 = vld [vmem:[#allocation5 + $0xfc8] sm:$0xff] }
  0x82   :  { %1129 = vmatprep.subr.mxu1 %v677_v49  ;;  %1053 = vmatpush1.msra.mxu0 %v484_v50  ;;  %v773_v49 = vld [vmem:[#allocation5 + $0x15c8] sm:$0xff]  ;;  %v580_v50 = vld [vmem:[#allocation5 + $0xfc0] sm:$0xff] }
  0x83   :  { %1130 = vmatpush1.msra.mxu1 %v676_v51  ;;  %1054 = vmatprep.subr.mxu0 %v479_v52  ;;  %v772_v51 = vld [vmem:[#allocation5 + $0x15c0] sm:$0xff]  ;;  %v575_v52 = vld [vmem:[#allocation5 + $0xf98] sm:$0xff] }
  0x84   :  { %1131 = vmatprep.subr.mxu1 %v671_v53  ;;  %1055 = vmatpush1.msra.mxu0 %v478_v54  ;;  %v767_v53 = vld [vmem:[#allocation5 + $0x1598] sm:$0xff]  ;;  %v574_v54 = vld [vmem:[#allocation5 + $0xf90] sm:$0xff] }
  0x85   :  { %1132 = vmatpush1.msra.mxu1 %v670_v55  ;;  %1056 = vmatprep.subr.mxu0 %v473_v56  ;;  %v766_v55 = vld [vmem:[#allocation5 + $0x1590] sm:$0xff]  ;;  %v69_v56 = vld [vmem:[#allocation2 + $0x48] sm:$0xff] }
  0x86   :  { %1133 = vmatprep.subr.mxu1 %v665_v57  ;;  %1057 = vmatpush1.msra.mxu0 %v472_v58  ;;  %v569_v57 = vld [vmem:[#allocation5 + $0xf68] sm:$0xff] }
  0x87   :  { %1134 = vmatpush1.msra.mxu1 %v664_v59  ;;  %1058 = vmatprep.subr.mxu0 %v467_v60  ;;  %v761_v58 = vld [vmem:[#allocation5 + $0x1568] sm:$0xff]  ;;  %v68_v59 = vld [vmem:[#allocation2 + $0x40] sm:$0xff] }
  0x88   :  { %1135 = vmatprep.subr.mxu1 %v659_v61  ;;  %1059 = vmatpush1.msra.mxu0 %v466_v62  ;;  %v568_v60 = vld [vmem:[#allocation5 + $0xf60] sm:$0xff]  ;;  %v71_v62 = vld [vmem:[#allocation2 + $0x58] sm:$0xff] }
  0x89   :  { %1136 = vmatpush1.msra.mxu1 %v658_v63  ;;  %1060 = vmatprep.subr.mxu0 %v461_v0  ;;  %v760_v61 = vld [vmem:[#allocation5 + $0x1560] sm:$0xff]  ;;  %v563_v63 = vld [vmem:[#allocation5 + $0xf38] sm:$0xff] }
  0x8a   :  { %1137 = vmatprep.subr.mxu1 %v653_v1  ;;  %1061 = vmatpush1.msra.mxu0 %v460_v2  ;;  %v755_v0 = vld [vmem:[#allocation5 + $0x1538] sm:$0xff]  ;;  %v70_v1 = vld [vmem:[#allocation2 + $0x50] sm:$0xff] }
  0x8b   :  { %1138 = vmatpush1.msra.mxu1 %v652_v3  ;;  %1062 = vmatprep.subr.mxu0 %v647_v4  ;;  %v562_v2 = vld [vmem:[#allocation5 + $0xf30] sm:$0xff]  ;;  %v557_v4 = vld [vmem:[#allocation5 + $0xf08] sm:$0xff] }
  0x8c   :  { %1139 = vmatprep.subr.mxu1 %v839_v5  ;;  %1063 = vmatpush2.msra.mxu0 %v646_v6  ;;  %v754_v3 = vld [vmem:[#allocation5 + $0x1530] sm:$0xff]  ;;  %v749_v5 = vld [vmem:[#allocation5 + $0x1508] sm:$0xff]  ;;  %v556_v6 = vld [vmem:[#allocation5 + $0xf00] sm:$0xff] }
  0x8d   :  { %1140 = vmatpush2.msra.mxu1 %v838_v7  ;;  %1064 = vmatprep.subr.mxu0 %v641_v8  ;;  %v65_v7 = vld [vmem:[#allocation2 + $0x28] sm:$0xff]  ;;  %v748_v8 = vld [vmem:[#allocation5 + $0x1500] sm:$0xff] }
  0x8e   :  { %1141 = vmatprep.subr.mxu1 %v833_v9  ;;  %1065 = vmatpush2.msra.mxu0 %v640_v10  ;;  %v64_v9 = vld [vmem:[#allocation2 + $0x20] sm:$0xff]  ;;  %v67_v10 = vld [vmem:[#allocation2 + $0x38] sm:$0xff] }
  0x8f   :  { %1142 = vmatpush2.msra.mxu1 %v832_v11  ;;  %1066 = vmatprep.subr.mxu0 %v635_v12  ;;  %v169_v11 = vld [vmem:[#allocation5 + $0x2e8] sm:$0xff] }
  0x90   :  { %1143 = vmatprep.subr.mxu1 %v827_v13  ;;  %1067 = vmatpush2.msra.mxu0 %v634_v14  ;;  %v361_v12 = vld [vmem:[#allocation5 + $0x8e8] sm:$0xff]  ;;  %v66_v13 = vld [vmem:[#allocation2 + $0x30] sm:$0xff]  ;;  %v168_v14 = vld [vmem:[#allocation5 + $0x2e0] sm:$0xff] }
  0x91   :  { %1144 = vmatpush2.msra.mxu1 %v826_v15  ;;  %1068 = vmatprep.subr.mxu0 %v629_v16  ;;  %v360_v15 = vld [vmem:[#allocation5 + $0x8e0] sm:$0xff]  ;;  %v163_v16 = vld [vmem:[#allocation5 + $0x2b8] sm:$0xff] }
  0x92   :  { %1145 = vmatprep.subr.mxu1 %v821_v17  ;;  %1069 = vmatpush2.msra.mxu0 %v628_v18  ;;  %v355_v17 = vld [vmem:[#allocation5 + $0x8b8] sm:$0xff]  ;;  %v73_v18 = vld [vmem:[#allocation2 + $0x68] sm:$0xff] }
  0x93   :  { %1146 = vmatpush2.msra.mxu1 %v820_v19  ;;  %1070 = vmatprep.subr.mxu0 %v623_v20  ;;  %v162_v19 = vld [vmem:[#allocation5 + $0x2b0] sm:$0xff] }
  0x94   :  { %1147 = vmatprep.subr.mxu1 %v815_v21  ;;  %1071 = vmatpush2.msra.mxu0 %v622_v22  ;;  %v354_v20 = vld [vmem:[#allocation5 + $0x8b0] sm:$0xff]  ;;  %v72_v21 = vld [vmem:[#allocation2 + $0x60] sm:$0xff]  ;;  %v157_v22 = vld [vmem:[#allocation5 + $0x288] sm:$0xff] }
  0x95   :  { %1148 = vmatpush2.msra.mxu1 %v814_v23  ;;  %1072 = vmatprep.subr.mxu0 %v617_v24  ;;  %v349_v23 = vld [vmem:[#allocation5 + $0x888] sm:$0xff]  ;;  %v75_v24 = vld [vmem:[#allocation2 + $0x78] sm:$0xff] }
  0x96   :  { %1149 = vmatprep.subr.mxu1 %v809_v25  ;;  %1073 = vmatpush2.msra.mxu0 %v616_v26  ;;  %v156_v25 = vld [vmem:[#allocation5 + $0x280] sm:$0xff] }
  0x97   :  { %1150 = vmatpush2.msra.mxu1 %v808_v27  ;;  %1074 = vmatprep.subr.mxu0 %v611_v28  ;;  %v348_v26 = vld [vmem:[#allocation5 + $0x880] sm:$0xff]  ;;  %v151_v27 = vld [vmem:[#allocation5 + $0x258] sm:$0xff]  ;;  %v74_v28 = vld [vmem:[#allocation2 + $0x70] sm:$0xff] }
  0x98   :  { %1151 = vmatprep.subr.mxu1 %v803_v29  ;;  %1075 = vmatpush2.msra.mxu0 %v610_v30  ;;  %v343_v29 = vld [vmem:[#allocation5 + $0x858] sm:$0xff]  ;;  %v150_v30 = vld [vmem:[#allocation5 + $0x250] sm:$0xff] }
  0x99   :  { %1152 = vmatpush2.msra.mxu1 %v802_v31  ;;  %1076 = vmatprep.subr.mxu0 %v605_v32  ;;  %v342_v31 = vld [vmem:[#allocation5 + $0x850] sm:$0xff]  ;;  %v145_v32 = vld [vmem:[#allocation5 + $0x228] sm:$0xff] }
  0x9a   :  { %1153 = vmatprep.subr.mxu1 %v797_v33  ;;  %1077 = vmatpush2.msra.mxu0 %v604_v34  ;;  %v337_v33 = vld [vmem:[#allocation5 + $0x828] sm:$0xff]  ;;  %v144_v34 = vld [vmem:[#allocation5 + $0x220] sm:$0xff] }
  0x9b   :  { %1154 = vmatpush2.msra.mxu1 %v796_v35  ;;  %1078 = vmatprep.subr.mxu0 %v599_v36  ;;  %v336_v35 = vld [vmem:[#allocation5 + $0x820] sm:$0xff]  ;;  %v139_v36 = vld [vmem:[#allocation5 + $0x1f8] sm:$0xff] }
  0x9c   :  { %1155 = vmatprep.subr.mxu1 %v791_v37  ;;  %1079 = vmatpush2.msra.mxu0 %v598_v38  ;;  %v331_v37 = vld [vmem:[#allocation5 + $0x7f8] sm:$0xff]  ;;  %v138_v38 = vld [vmem:[#allocation5 + $0x1f0] sm:$0xff] }
  0x9d   :  { %1156 = vmatpush2.msra.mxu1 %v790_v39  ;;  %1080 = vmatprep.subr.mxu0 %v593_v40  ;;  %v330_v39 = vld [vmem:[#allocation5 + $0x7f0] sm:$0xff]  ;;  %v133_v40 = vld [vmem:[#allocation5 + $0x1c8] sm:$0xff] }
  0x9e   :  { %1157 = vmatprep.subr.mxu1 %v785_v41  ;;  %1081 = vmatpush2.msra.mxu0 %v592_v42  ;;  %v325_v41 = vld [vmem:[#allocation5 + $0x7c8] sm:$0xff]  ;;  %v132_v42 = vld [vmem:[#allocation5 + $0x1c0] sm:$0xff] }
  0x9f   :  { %1158 = vmatpush2.msra.mxu1 %v784_v43  ;;  %1082 = vmatprep.subr.mxu0 %v587_v44  ;;  %v324_v43 = vld [vmem:[#allocation5 + $0x7c0] sm:$0xff]  ;;  %v127_v44 = vld [vmem:[#allocation5 + $0x198] sm:$0xff] }
  0xa0   :  { %1159 = vmatprep.subr.mxu1 %v779_v45  ;;  %1083 = vmatpush2.msra.mxu0 %v586_v46  ;;  %v319_v45 = vld [vmem:[#allocation5 + $0x798] sm:$0xff]  ;;  %v126_v46 = vld [vmem:[#allocation5 + $0x190] sm:$0xff] }
  0xa1   :  { %1160 = vmatpush2.msra.mxu1 %v778_v47  ;;  %1084 = vmatprep.subr.mxu0 %v581_v48  ;;  %v318_v47 = vld [vmem:[#allocation5 + $0x790] sm:$0xff]  ;;  %v121_v48 = vld [vmem:[#allocation5 + $0x168] sm:$0xff] }
  0xa2   :  { %1161 = vmatprep.subr.mxu1 %v773_v49  ;;  %1085 = vmatpush2.msra.mxu0 %v580_v50  ;;  %v313_v49 = vld [vmem:[#allocation5 + $0x768] sm:$0xff]  ;;  %v120_v50 = vld [vmem:[#allocation5 + $0x160] sm:$0xff] }
  0xa3   :  { %1162 = vmatpush2.msra.mxu1 %v772_v51  ;;  %1086 = vmatprep.subr.mxu0 %v575_v52  ;;  %v312_v51 = vld [vmem:[#allocation5 + $0x760] sm:$0xff]  ;;  %v115_v52 = vld [vmem:[#allocation5 + $0x138] sm:$0xff] }
  0xa4   :  { %1163 = vmatprep.subr.mxu1 %v767_v53  ;;  %1087 = vmatpush2.msra.mxu0 %v574_v54  ;;  %v307_v53 = vld [vmem:[#allocation5 + $0x738] sm:$0xff]  ;;  %v114_v54 = vld [vmem:[#allocation5 + $0x130] sm:$0xff] }
  0xa5   :  { %1164 = vmatpush2.msra.mxu1 %v766_v55  ;;  %946 = vmatprep.mubr.f32.mxu0 %v69_v56  ;;  %v306_v55 = vld [vmem:[#allocation5 + $0x730] sm:$0xff]  ;;  %v109_v56 = vld [vmem:[#allocation5 + $0x108] sm:$0xff] }
  0xa6   :  { %1088 = vmatprep.subr.mxu0 %v569_v57  ;;  %1165 = vmatprep.subr.mxu1 %v761_v58  ;;  %v301_v57 = vld [vmem:[#allocation5 + $0x708] sm:$0xff]  ;;  %v108_v58 = vld [vmem:[#allocation5 + $0x100] sm:$0xff] }
  0xa7   :  { %947 = vmatmul.mubr.f32.gmra.mxu0 %v68_v59  ;;  %1166 = vmatpush2.msra.mxu1 %v760_v61  ;;  %v300_v59 = vld [vmem:[#allocation5 + $0x700] sm:$0xff]  ;;  %v295_v61 = vld [vmem:[#allocation5 + $0x6d8] sm:$0xff] }
  0xa8   :  { %1089 = vmatpush2.msra.mxu0 %v568_v60  ;;  %1023 = vmatprep.mubr.f32.mxu1 %v71_v62  ;;  %v103_v60 = vld [vmem:[#allocation5 + $0xd8] sm:$0xff]  ;;  %v102_v62 = vld [vmem:[#allocation5 + $0xd0] sm:$0xff] }
  0xa9   :  { %1090 = vmatprep.subr.mxu0 %v563_v63  ;;  %1167 = vmatprep.subr.mxu1 %v755_v0  ;;  %v294_v63 = vld [vmem:[#allocation5 + $0x6d0] sm:$0xff]  ;;  %v97_v0 = vld [vmem:[#allocation5 + $0xa8] sm:$0xff] }
  0xaa   :  { %1024 = vmatmul.mubr.f32.gmra.mxu1 %v70_v1  ;;  %1091 = vmatpush2.msra.mxu0 %v562_v2  ;;  %v289_v1 = vld [vmem:[#allocation5 + $0x6a8] sm:$0xff]  ;;  %v96_v2 = vld [vmem:[#allocation5 + $0xa0] sm:$0xff] }
  0xab   :  { %1168 = vmatpush2.msra.mxu1 %v754_v3  ;;  %1092 = vmatprep.subr.mxu0 %v557_v4  ;;  %v288_v3 = vld [vmem:[#allocation5 + $0x6a0] sm:$0xff]  ;;  %v91_v4 = vld [vmem:[#allocation5 + $0x78] sm:$0xff] }
  0xac   :  { %1169 = vmatprep.subr.mxu1 %v749_v5  ;;  %1093 = vmatpush2.msra.mxu0 %v556_v6  ;;  %v283_v5 = vld [vmem:[#allocation5 + $0x678] sm:$0xff]  ;;  %v90_v6 = vld [vmem:[#allocation5 + $0x70] sm:$0xff] }
  0xad   :  { %1094 = vmatprep.mubr.f32.mxu0 %v65_v7  ;;  %1170 = vmatpush2.msra.mxu1 %v748_v8  ;;  %v282_v7 = vld [vmem:[#allocation5 + $0x670] sm:$0xff]  ;;  %v85_v8 = vld [vmem:[#allocation5 + $0x48] sm:$0xff] }
  0xae   :  { %1095 = vmatmul.mubr.f32.vlgmr.msra.gmra.mxu0 %v64_v9  ;;  %1171 = vmatprep.mubr.f32.mxu1 %v67_v10  ;;  %v277_v9 = vld [vmem:[#allocation5 + $0x648] sm:$0xff]  ;;  %v84_v10 = vld [vmem:[#allocation5 + $0x40] sm:$0xff] }
  0xaf   :  { %1184 = vmatprep.subr.mxu0 %v169_v11  ;;  %1261 = vmatprep.subr.mxu1 %v361_v12  ;;  %v276_v11 = vld [vmem:[#allocation5 + $0x640] sm:$0xff]  ;;  %v79_v12 = vld [vmem:[#allocation5 + $0x18] sm:$0xff] }
  0xb0   :  { %1172 = vmatmul.mubr.f32.vlgmr.msra.gmra.mxu1 %v66_v13  ;;  %1185 = vmatpush1.msra.mxu0 %v168_v14  ;;  %v271_v13 = vld [vmem:[#allocation5 + $0x618] sm:$0xff]  ;;  %v78_v14 = vld [vmem:[#allocation5 + $0x10] sm:$0xff] }
  0xb1   :  { %1262 = vmatpush1.msra.mxu1 %v360_v15  ;;  %1186 = vmatprep.subr.mxu0 %v163_v16  ;;  %v270_v15 = vld [vmem:[#allocation5 + $0x610] sm:$0xff]  ;;  %v265_v16 = vld [vmem:[#allocation5 + $0x5e8] sm:$0xff] }
  0xb2   :  { %1263 = vmatprep.subr.mxu1 %v355_v17  ;;  %1100 = vmatprep.mubr.f32.mxu0 %v73_v18  ;;  %v457_v17 = vld [vmem:[#allocation5 + $0xbe8] sm:$0xff]  ;;  %v264_v18 = vld [vmem:[#allocation5 + $0x5e0] sm:$0xff] }
  0xb3   :  { %1187 = vmatpush1.msra.mxu0 %v162_v19  ;;  %1264 = vmatpush1.msra.mxu1 %v354_v20  ;;  %v456_v19 = vld [vmem:[#allocation5 + $0xbe0] sm:$0xff]  ;;  %v259_v20 = vld [vmem:[#allocation5 + $0x5b8] sm:$0xff] }
  0xb4   :  { %1101 = vmatmul.mubr.f32.gmra.mxu0 %v72_v21  ;;  %1188 = vmatprep.subr.mxu0 %v157_v22  ;;  %v451_v21 = vld [vmem:[#allocation5 + $0xbb8] sm:$0xff]  ;;  %v258_v22 = vld [vmem:[#allocation5 + $0x5b0] sm:$0xff] }
  0xb5   :  { %1265 = vmatprep.subr.mxu1 %v349_v23  ;;  %1177 = vmatprep.mubr.f32.mxu1 %v75_v24  ;;  %v450_v23 = vld [vmem:[#allocation5 + $0xbb0] sm:$0xff]  ;;  %v253_v24 = vld [vmem:[#allocation5 + $0x588] sm:$0xff] }
  0xb6   :  { %1189 = vmatpush1.msra.mxu0 %v156_v25  ;;  %1266 = vmatpush1.msra.mxu1 %v348_v26  ;;  %v445_v25 = vld [vmem:[#allocation5 + $0xb88] sm:$0xff]  ;;  %v252_v26 = vld [vmem:[#allocation5 + $0x580] sm:$0xff] }
  0xb7   :  { %1190 = vmatprep.subr.mxu0 %v151_v27  ;;  %1178 = vmatmul.mubr.f32.gmra.mxu1 %v74_v28  ;;  %v444_v27 = vld [vmem:[#allocation5 + $0xb80] sm:$0xff]  ;;  %v247_v28 = vld [vmem:[#allocation5 + $0x558] sm:$0xff] }
  0xb8   :  { %1267 = vmatprep.subr.mxu1 %v343_v29  ;;  %1191 = vmatpush1.msra.mxu0 %v150_v30  ;;  %v439_v29 = vld [vmem:[#allocation5 + $0xb58] sm:$0xff]  ;;  %v246_v30 = vld [vmem:[#allocation5 + $0x550] sm:$0xff] }
  0xb9   :  { %1268 = vmatpush1.msra.mxu1 %v342_v31  ;;  %1192 = vmatprep.subr.mxu0 %v145_v32  ;;  %v438_v31 = vld [vmem:[#allocation5 + $0xb50] sm:$0xff]  ;;  %v241_v32 = vld [vmem:[#allocation5 + $0x528] sm:$0xff] }
  0xba   :  { %1269 = vmatprep.subr.mxu1 %v337_v33  ;;  %1193 = vmatpush1.msra.mxu0 %v144_v34  ;;  %v433_v33 = vld [vmem:[#allocation5 + $0xb28] sm:$0xff]  ;;  %v240_v34 = vld [vmem:[#allocation5 + $0x520] sm:$0xff] }
  0xbb   :  { %1270 = vmatpush1.msra.mxu1 %v336_v35  ;;  %1194 = vmatprep.subr.mxu0 %v139_v36  ;;  %v432_v35 = vld [vmem:[#allocation5 + $0xb20] sm:$0xff]  ;;  %v235_v36 = vld [vmem:[#allocation5 + $0x4f8] sm:$0xff] }
  0xbc   :  { %1271 = vmatprep.subr.mxu1 %v331_v37  ;;  %1195 = vmatpush1.msra.mxu0 %v138_v38  ;;  %v427_v37 = vld [vmem:[#allocation5 + $0xaf8] sm:$0xff]  ;;  %v234_v38 = vld [vmem:[#allocation5 + $0x4f0] sm:$0xff] }
  0xbd   :  { %1272 = vmatpush1.msra.mxu1 %v330_v39  ;;  %1196 = vmatprep.subr.mxu0 %v133_v40  ;;  %v426_v39 = vld [vmem:[#allocation5 + $0xaf0] sm:$0xff]  ;;  %v229_v40 = vld [vmem:[#allocation5 + $0x4c8] sm:$0xff] }
  0xbe   :  { %1273 = vmatprep.subr.mxu1 %v325_v41  ;;  %1197 = vmatpush1.msra.mxu0 %v132_v42  ;;  %v421_v41 = vld [vmem:[#allocation5 + $0xac8] sm:$0xff]  ;;  %v228_v42 = vld [vmem:[#allocation5 + $0x4c0] sm:$0xff] }
  0xbf   :  { %1274 = vmatpush1.msra.mxu1 %v324_v43  ;;  %1198 = vmatprep.subr.mxu0 %v127_v44  ;;  %v420_v43 = vld [vmem:[#allocation5 + $0xac0] sm:$0xff]  ;;  %v223_v44 = vld [vmem:[#allocation5 + $0x498] sm:$0xff] }
  0xc0   :  { %1275 = vmatprep.subr.mxu1 %v319_v45  ;;  %1199 = vmatpush1.msra.mxu0 %v126_v46  ;;  %v415_v45 = vld [vmem:[#allocation5 + $0xa98] sm:$0xff]  ;;  %v222_v46 = vld [vmem:[#allocation5 + $0x490] sm:$0xff] }
  0xc1   :  { %1276 = vmatpush1.msra.mxu1 %v318_v47  ;;  %1200 = vmatprep.subr.mxu0 %v121_v48  ;;  %v414_v47 = vld [vmem:[#allocation5 + $0xa90] sm:$0xff]  ;;  %v217_v48 = vld [vmem:[#allocation5 + $0x468] sm:$0xff] }
  0xc2   :  { %1277 = vmatprep.subr.mxu1 %v313_v49  ;;  %1201 = vmatpush1.msra.mxu0 %v120_v50  ;;  %v409_v49 = vld [vmem:[#allocation5 + $0xa68] sm:$0xff]  ;;  %v216_v50 = vld [vmem:[#allocation5 + $0x460] sm:$0xff] }
  0xc3   :  { %1278 = vmatpush1.msra.mxu1 %v312_v51  ;;  %1202 = vmatprep.subr.mxu0 %v115_v52  ;;  %v408_v51 = vld [vmem:[#allocation5 + $0xa60] sm:$0xff]  ;;  %v211_v52 = vld [vmem:[#allocation5 + $0x438] sm:$0xff] }
  0xc4   :  { %1279 = vmatprep.subr.mxu1 %v307_v53  ;;  %1203 = vmatpush1.msra.mxu0 %v114_v54  ;;  %v403_v53 = vld [vmem:[#allocation5 + $0xa38] sm:$0xff]  ;;  %v210_v54 = vld [vmem:[#allocation5 + $0x430] sm:$0xff] }
  0xc5   :  { %1280 = vmatpush1.msra.mxu1 %v306_v55  ;;  %1204 = vmatprep.subr.mxu0 %v109_v56  ;;  %v402_v55 = vld [vmem:[#allocation5 + $0xa30] sm:$0xff]  ;;  %v205_v56 = vld [vmem:[#allocation5 + $0x408] sm:$0xff] }
  0xc6   :  { %1281 = vmatprep.subr.mxu1 %v301_v57  ;;  %1205 = vmatpush1.msra.mxu0 %v108_v58  ;;  %v397_v57 = vld [vmem:[#allocation5 + $0xa08] sm:$0xff]  ;;  %v204_v58 = vld [vmem:[#allocation5 + $0x400] sm:$0xff] }
  0xc7   :  { %1282 = vmatpush1.msra.mxu1 %v300_v59  ;;  %1206 = vmatprep.subr.mxu0 %v103_v60  ;;  %v396_v59 = vld [vmem:[#allocation5 + $0xa00] sm:$0xff]  ;;  %v199_v60 = vld [vmem:[#allocation5 + $0x3d8] sm:$0xff] }
  0xc8   :  { %1283 = vmatprep.subr.mxu1 %v295_v61  ;;  %1207 = vmatpush1.msra.mxu0 %v102_v62  ;;  %v391_v61 = vld [vmem:[#allocation5 + $0x9d8] sm:$0xff]  ;;  %v198_v62 = vld [vmem:[#allocation5 + $0x3d0] sm:$0xff] }
  0xc9   :  { %1284 = vmatpush1.msra.mxu1 %v294_v63  ;;  %1208 = vmatprep.subr.mxu0 %v97_v0  ;;  %v390_v63 = vld [vmem:[#allocation5 + $0x9d0] sm:$0xff]  ;;  %v193_v0 = vld [vmem:[#allocation5 + $0x3a8] sm:$0xff] }
  0xca   :  { %1285 = vmatprep.subr.mxu1 %v289_v1  ;;  %1209 = vmatpush1.msra.mxu0 %v96_v2  ;;  %v385_v1 = vld [vmem:[#allocation5 + $0x9a8] sm:$0xff]  ;;  %v192_v2 = vld [vmem:[#allocation5 + $0x3a0] sm:$0xff] }
  0xcb   :  { %1286 = vmatpush1.msra.mxu1 %v288_v3  ;;  %1210 = vmatprep.subr.mxu0 %v91_v4  ;;  %v384_v3 = vld [vmem:[#allocation5 + $0x9a0] sm:$0xff]  ;;  %v187_v4 = vld [vmem:[#allocation5 + $0x378] sm:$0xff] }
  0xcc   :  { %1287 = vmatprep.subr.mxu1 %v283_v5  ;;  %1211 = vmatpush1.msra.mxu0 %v90_v6  ;;  %v379_v5 = vld [vmem:[#allocation5 + $0x978] sm:$0xff]  ;;  %v186_v6 = vld [vmem:[#allocation5 + $0x370] sm:$0xff] }
  0xcd   :  { %1288 = vmatpush1.msra.mxu1 %v282_v7  ;;  %1212 = vmatprep.subr.mxu0 %v85_v8  ;;  %v378_v7 = vld [vmem:[#allocation5 + $0x970] sm:$0xff]  ;;  %v181_v8 = vld [vmem:[#allocation5 + $0x348] sm:$0xff] }
  0xce   :  { %1289 = vmatprep.subr.mxu1 %v277_v9  ;;  %1213 = vmatpush1.msra.mxu0 %v84_v10  ;;  %v373_v9 = vld [vmem:[#allocation5 + $0x948] sm:$0xff]  ;;  %v180_v10 = vld [vmem:[#allocation5 + $0x340] sm:$0xff] }
  0xcf   :  { %1290 = vmatpush1.msra.mxu1 %v276_v11  ;;  %1214 = vmatprep.subr.mxu0 %v79_v12  ;;  %v372_v11 = vld [vmem:[#allocation5 + $0x940] sm:$0xff]  ;;  %v175_v12 = vld [vmem:[#allocation5 + $0x318] sm:$0xff] }
  0xd0   :  { %1291 = vmatprep.subr.mxu1 %v271_v13  ;;  %1215 = vmatpush1.msra.mxu0 %v78_v14  ;;  %v367_v13 = vld [vmem:[#allocation5 + $0x918] sm:$0xff]  ;;  %v174_v14 = vld [vmem:[#allocation5 + $0x310] sm:$0xff] }
  0xd1   :  { %1292 = vmatpush1.msra.mxu1 %v270_v15  ;;  %1216 = vmatprep.subr.mxu0 %v265_v16  ;;  %v366_v15 = vld [vmem:[#allocation5 + $0x910] sm:$0xff]  ;;  %v553_v16 = vld [vmem:[#allocation5 + $0xee8] sm:$0xff] }
  0xd2   :  { %1293 = vmatprep.subr.mxu1 %v457_v17  ;;  %1217 = vmatpush2.msra.mxu0 %v264_v18  ;;  %v1840_v17 = vld [vmem:[#allocation2 + $0x8] sm:$0xff] }
  0xd3   :  { %1294 = vmatpush2.msra.mxu1 %v456_v19  ;;  %1218 = vmatprep.subr.mxu0 %v259_v20  ;;  %v745_v18 = vld [vmem:[#allocation5 + $0x14e8] sm:$0xff]  ;;  %v1841_v19 = vld [vmem:[#allocation2] sm:$0xff] }
  0xd4   :  { %1295 = vmatprep.subr.mxu1 %v451_v21  ;;  %1219 = vmatpush2.msra.mxu0 %v258_v22  ;;  %v552_v20 = vld [vmem:[#allocation5 + $0xee0] sm:$0xff]  ;;  %v1842_v22 = vld [vmem:[#allocation2 + $0x18] sm:$0xff] }
  0xd5   :  { %1296 = vmatpush2.msra.mxu1 %v450_v23  ;;  %1220 = vmatprep.subr.mxu0 %v253_v24  ;;  %v744_v21 = vld [vmem:[#allocation5 + $0x14e0] sm:$0xff]  ;;  %v547_v23 = vld [vmem:[#allocation5 + $0xeb8] sm:$0xff] }
  0xd6   :  { %1297 = vmatprep.subr.mxu1 %v445_v25  ;;  %1221 = vmatpush2.msra.mxu0 %v252_v26  ;;  %v739_v24 = vld [vmem:[#allocation5 + $0x14b8] sm:$0xff]  ;;  %v1843_v25 = vld [vmem:[#allocation2 + $0x10] sm:$0xff] }
  0xd7   :  { %1298 = vmatpush2.msra.mxu1 %v444_v27  ;;  %1222 = vmatprep.subr.mxu0 %v247_v28  ;;  %v546_v26 = vld [vmem:[#allocation5 + $0xeb0] sm:$0xff]  ;;  %v541_v28 = vld [vmem:[#allocation5 + $0xe88] sm:$0xff] }
  0xd8   :  { %1299 = vmatprep.subr.mxu1 %v439_v29  ;;  %1223 = vmatpush2.msra.mxu0 %v246_v30  ;;  %v738_v27 = vld [vmem:[#allocation5 + $0x14b0] sm:$0xff]  ;;  %v733_v29 = vld [vmem:[#allocation5 + $0x1488] sm:$0xff]  ;;  %v540_v30 = vld [vmem:[#allocation5 + $0xe80] sm:$0xff] }
  0xd9   :  { %1300 = vmatpush2.msra.mxu1 %v438_v31  ;;  %1224 = vmatprep.subr.mxu0 %v241_v32  ;;  %v732_v31 = vld [vmem:[#allocation5 + $0x1480] sm:$0xff]  ;;  %v535_v32 = vld [vmem:[#allocation5 + $0xe58] sm:$0xff] }
  0xda   :  { %1301 = vmatprep.subr.mxu1 %v433_v33  ;;  %1225 = vmatpush2.msra.mxu0 %v240_v34  ;;  %v727_v33 = vld [vmem:[#allocation5 + $0x1458] sm:$0xff]  ;;  %v534_v34 = vld [vmem:[#allocation5 + $0xe50] sm:$0xff] }
  0xdb   :  { %1302 = vmatpush2.msra.mxu1 %v432_v35  ;;  %1226 = vmatprep.subr.mxu0 %v235_v36  ;;  %v726_v35 = vld [vmem:[#allocation5 + $0x1450] sm:$0xff]  ;;  %v529_v36 = vld [vmem:[#allocation5 + $0xe28] sm:$0xff] }
  0xdc   :  { %1303 = vmatprep.subr.mxu1 %v427_v37  ;;  %1227 = vmatpush2.msra.mxu0 %v234_v38  ;;  %v721_v37 = vld [vmem:[#allocation5 + $0x1428] sm:$0xff]  ;;  %v528_v38 = vld [vmem:[#allocation5 + $0xe20] sm:$0xff] }
  0xdd   :  { %1304 = vmatpush2.msra.mxu1 %v426_v39  ;;  %1228 = vmatprep.subr.mxu0 %v229_v40  ;;  %v720_v39 = vld [vmem:[#allocation5 + $0x1420] sm:$0xff]  ;;  %v523_v40 = vld [vmem:[#allocation5 + $0xdf8] sm:$0xff] }
  0xde   :  { %1305 = vmatprep.subr.mxu1 %v421_v41  ;;  %1229 = vmatpush2.msra.mxu0 %v228_v42  ;;  %v715_v41 = vld [vmem:[#allocation5 + $0x13f8] sm:$0xff]  ;;  %v522_v42 = vld [vmem:[#allocation5 + $0xdf0] sm:$0xff] }
  0xdf   :  { %1306 = vmatpush2.msra.mxu1 %v420_v43  ;;  %1230 = vmatprep.subr.mxu0 %v223_v44  ;;  %v714_v43 = vld [vmem:[#allocation5 + $0x13f0] sm:$0xff]  ;;  %v517_v44 = vld [vmem:[#allocation5 + $0xdc8] sm:$0xff] }
  0xe0   :  { %1307 = vmatprep.subr.mxu1 %v415_v45  ;;  %1231 = vmatpush2.msra.mxu0 %v222_v46  ;;  %v709_v45 = vld [vmem:[#allocation5 + $0x13c8] sm:$0xff]  ;;  %v516_v46 = vld [vmem:[#allocation5 + $0xdc0] sm:$0xff] }
  0xe1   :  { %1308 = vmatpush2.msra.mxu1 %v414_v47  ;;  %1232 = vmatprep.subr.mxu0 %v217_v48  ;;  %v708_v47 = vld [vmem:[#allocation5 + $0x13c0] sm:$0xff]  ;;  %v511_v48 = vld [vmem:[#allocation5 + $0xd98] sm:$0xff] }
  0xe2   :  { %1309 = vmatprep.subr.mxu1 %v409_v49  ;;  %1233 = vmatpush2.msra.mxu0 %v216_v50  ;;  %v703_v49 = vld [vmem:[#allocation5 + $0x1398] sm:$0xff]  ;;  %v510_v50 = vld [vmem:[#allocation5 + $0xd90] sm:$0xff] }
  0xe3   :  { %1310 = vmatpush2.msra.mxu1 %v408_v51  ;;  %1234 = vmatprep.subr.mxu0 %v211_v52  ;;  %v702_v51 = vld [vmem:[#allocation5 + $0x1390] sm:$0xff]  ;;  %v505_v52 = vld [vmem:[#allocation5 + $0xd68] sm:$0xff] }
  0xe4   :  { %1311 = vmatprep.subr.mxu1 %v403_v53  ;;  %1235 = vmatpush2.msra.mxu0 %v210_v54  ;;  %v697_v53 = vld [vmem:[#allocation5 + $0x1368] sm:$0xff]  ;;  %v504_v54 = vld [vmem:[#allocation5 + $0xd60] sm:$0xff] }
  0xe5   :  { %1312 = vmatpush2.msra.mxu1 %v402_v55  ;;  %1236 = vmatprep.subr.mxu0 %v205_v56  ;;  %v696_v55 = vld [vmem:[#allocation5 + $0x1360] sm:$0xff]  ;;  %v499_v56 = vld [vmem:[#allocation5 + $0xd38] sm:$0xff] }
  0xe6   :  { %1313 = vmatprep.subr.mxu1 %v397_v57  ;;  %1237 = vmatpush2.msra.mxu0 %v204_v58  ;;  %v691_v57 = vld [vmem:[#allocation5 + $0x1338] sm:$0xff]  ;;  %v498_v58 = vld [vmem:[#allocation5 + $0xd30] sm:$0xff] }
  0xe7   :  { %1314 = vmatpush2.msra.mxu1 %v396_v59  ;;  %1238 = vmatprep.subr.mxu0 %v199_v60  ;;  %v690_v59 = vld [vmem:[#allocation5 + $0x1330] sm:$0xff]  ;;  %v493_v60 = vld [vmem:[#allocation5 + $0xd08] sm:$0xff] }
  0xe8   :  { %1315 = vmatprep.subr.mxu1 %v391_v61  ;;  %1239 = vmatpush2.msra.mxu0 %v198_v62  ;;  %v685_v61 = vld [vmem:[#allocation5 + $0x1308] sm:$0xff]  ;;  %v492_v62 = vld [vmem:[#allocation5 + $0xd00] sm:$0xff] }
  0xe9   :  { %1316 = vmatpush2.msra.mxu1 %v390_v63  ;;  %1240 = vmatprep.subr.mxu0 %v193_v0  ;;  %v684_v63 = vld [vmem:[#allocation5 + $0x1300] sm:$0xff]  ;;  %v487_v0 = vld [vmem:[#allocation5 + $0xcd8] sm:$0xff] }
  0xea   :  { %1317 = vmatprep.subr.mxu1 %v385_v1  ;;  %1241 = vmatpush2.msra.mxu0 %v192_v2  ;;  %v679_v1 = vld [vmem:[#allocation5 + $0x12d8] sm:$0xff]  ;;  %v486_v2 = vld [vmem:[#allocation5 + $0xcd0] sm:$0xff] }
  0xeb   :  { %1318 = vmatpush2.msra.mxu1 %v384_v3  ;;  %1242 = vmatprep.subr.mxu0 %v187_v4  ;;  %v678_v3 = vld [vmem:[#allocation5 + $0x12d0] sm:$0xff]  ;;  %v481_v4 = vld [vmem:[#allocation5 + $0xca8] sm:$0xff] }
  0xec   :  { %1319 = vmatprep.subr.mxu1 %v379_v5  ;;  %1243 = vmatpush2.msra.mxu0 %v186_v6  ;;  %v673_v5 = vld [vmem:[#allocation5 + $0x12a8] sm:$0xff]  ;;  %v480_v6 = vld [vmem:[#allocation5 + $0xca0] sm:$0xff] }
  0xed   :  { %1320 = vmatpush2.msra.mxu1 %v378_v7  ;;  %1244 = vmatprep.subr.mxu0 %v181_v8  ;;  %v672_v7 = vld [vmem:[#allocation5 + $0x12a0] sm:$0xff]  ;;  %v475_v8 = vld [vmem:[#allocation5 + $0xc78] sm:$0xff] }
  0xee   :  { %1321 = vmatprep.subr.mxu1 %v373_v9  ;;  %1245 = vmatpush2.msra.mxu0 %v180_v10  ;;  %v667_v9 = vld [vmem:[#allocation5 + $0x1278] sm:$0xff]  ;;  %v474_v10 = vld [vmem:[#allocation5 + $0xc70] sm:$0xff] }
  0xef   :  { %1322 = vmatpush2.msra.mxu1 %v372_v11  ;;  %1246 = vmatprep.subr.mxu0 %v175_v12  ;;  %v666_v11 = vld [vmem:[#allocation5 + $0x1270] sm:$0xff]  ;;  %v469_v12 = vld [vmem:[#allocation5 + $0xc48] sm:$0xff] }
  0xf0   :  { %1323 = vmatprep.subr.mxu1 %v367_v13  ;;  %1247 = vmatpush2.msra.mxu0 %v174_v14  ;;  %v661_v13 = vld [vmem:[#allocation5 + $0x1248] sm:$0xff]  ;;  %v468_v14 = vld [vmem:[#allocation5 + $0xc40] sm:$0xff] }
  0xf1   :  { %1248 = vmatprep.mubr.f32.mxu0 %v1840_v17  ;;  %1324 = vmatpush2.msra.mxu1 %v366_v15  ;;  %v660_v15 = vld [vmem:[#allocation5 + $0x1240] sm:$0xff]  ;;  %v655_v17 = vld [vmem:[#allocation5 + $0x1218] sm:$0xff] }
  0xf2   :  { %1249 = vmatmul.mubr.f32.vlgmr.msra.gmra.mxu0 %v1841_v19  ;;  %1325 = vmatprep.mubr.f32.mxu1 %v1842_v22  ;;  %v654_v19 = vld [vmem:[#allocation5 + $0x1210] sm:$0xff]  ;;  %v648_v22 = vld [vmem:[#allocation5 + $0x11e0] sm:$0xff] }
  0xf3   :  { %1338 = vmatprep.subr.mxu0 %v553_v16  ;;  %1415 = vmatprep.subr.mxu1 %v745_v18  ;;  %v463_v16 = vld [vmem:[#allocation5 + $0xc18] sm:$0xff]  ;;  %v462_v18 = vld [vmem:[#allocation5 + $0xc10] sm:$0xff] }
  0xf4   :  { %1326 = vmatmul.mubr.f32.vlgmr.msra.gmra.mxu1 %v1843_v25  ;;  %1339 = vmatpush1.msra.mxu0 %v552_v20  ;;  %v649_v20 = vld [vmem:[#allocation5 + $0x11e8] sm:$0xff]  ;;  %v835_v25 = vld [vmem:[#allocation5 + $0x17b8] sm:$0xff] }
  0xf5   :  { %1416 = vmatpush1.msra.mxu1 %v744_v21  ;;  %1340 = vmatprep.subr.mxu0 %v547_v23  ;;  %v841_v21 = vld [vmem:[#allocation5 + $0x17e8] sm:$0xff]  ;;  %v840_v23 = vld [vmem:[#allocation5 + $0x17e0] sm:$0xff] }
  0xf6   :  { %1417 = vmatprep.subr.mxu1 %v739_v24  ;;  %1341 = vmatpush1.msra.mxu0 %v546_v26  ;;  %v643_v24 = vld [vmem:[#allocation5 + $0x11b8] sm:$0xff]  ;;  %v642_v26 = vld [vmem:[#allocation5 + $0x11b0] sm:$0xff] }
  0xf7   :  { %1418 = vmatpush1.msra.mxu1 %v738_v27  ;;  %1342 = vmatprep.subr.mxu0 %v541_v28  ;;  %v834_v27 = vld [vmem:[#allocation5 + $0x17b0] sm:$0xff]  ;;  %v637_v28 = vld [vmem:[#allocation5 + $0x1188] sm:$0xff] }
  0xf8   :  { %1419 = vmatprep.subr.mxu1 %v733_v29  ;;  %1343 = vmatpush1.msra.mxu0 %v540_v30  ;;  %v829_v29 = vld [vmem:[#allocation5 + $0x1788] sm:$0xff]  ;;  %v636_v30 = vld [vmem:[#allocation5 + $0x1180] sm:$0xff] }
  0xf9   :  { %1420 = vmatpush1.msra.mxu1 %v732_v31  ;;  %1344 = vmatprep.subr.mxu0 %v535_v32  ;;  %v828_v31 = vld [vmem:[#allocation5 + $0x1780] sm:$0xff]  ;;  %v631_v32 = vld [vmem:[#allocation5 + $0x1158] sm:$0xff] }
  0xfa   :  { %1421 = vmatprep.subr.mxu1 %v727_v33  ;;  %1345 = vmatpush1.msra.mxu0 %v534_v34  ;;  %v823_v33 = vld [vmem:[#allocation5 + $0x1758] sm:$0xff]  ;;  %v630_v34 = vld [vmem:[#allocation5 + $0x1150] sm:$0xff] }
  0xfb   :  { %1422 = vmatpush1.msra.mxu1 %v726_v35  ;;  %1346 = vmatprep.subr.mxu0 %v529_v36  ;;  %v822_v35 = vld [vmem:[#allocation5 + $0x1750] sm:$0xff]  ;;  %v625_v36 = vld [vmem:[#allocation5 + $0x1128] sm:$0xff] }
  0xfc   :  { %1423 = vmatprep.subr.mxu1 %v721_v37  ;;  %1347 = vmatpush1.msra.mxu0 %v528_v38  ;;  %v817_v37 = vld [vmem:[#allocation5 + $0x1728] sm:$0xff]  ;;  %v624_v38 = vld [vmem:[#allocation5 + $0x1120] sm:$0xff] }
  0xfd   :  { %1424 = vmatpush1.msra.mxu1 %v720_v39  ;;  %1348 = vmatprep.subr.mxu0 %v523_v40  ;;  %v816_v39 = vld [vmem:[#allocation5 + $0x1720] sm:$0xff]  ;;  %v619_v40 = vld [vmem:[#allocation5 + $0x10f8] sm:$0xff] }
  0xfe   :  { %1425 = vmatprep.subr.mxu1 %v715_v41  ;;  %1349 = vmatpush1.msra.mxu0 %v522_v42  ;;  %v811_v41 = vld [vmem:[#allocation5 + $0x16f8] sm:$0xff]  ;;  %v618_v42 = vld [vmem:[#allocation5 + $0x10f0] sm:$0xff] }
  0xff   :  { %1426 = vmatpush1.msra.mxu1 %v714_v43  ;;  %1350 = vmatprep.subr.mxu0 %v517_v44  ;;  %v810_v43 = vld [vmem:[#allocation5 + $0x16f0] sm:$0xff]  ;;  %v613_v44 = vld [vmem:[#allocation5 + $0x10c8] sm:$0xff] }
 0x100   :  { %1427 = vmatprep.subr.mxu1 %v709_v45  ;;  %1351 = vmatpush1.msra.mxu0 %v516_v46  ;;  %v805_v45 = vld [vmem:[#allocation5 + $0x16c8] sm:$0xff]  ;;  %v612_v46 = vld [vmem:[#allocation5 + $0x10c0] sm:$0xff] }
 0x101   :  { %1428 = vmatpush1.msra.mxu1 %v708_v47  ;;  %1352 = vmatprep.subr.mxu0 %v511_v48  ;;  %v804_v47 = vld [vmem:[#allocation5 + $0x16c0] sm:$0xff]  ;;  %v607_v48 = vld [vmem:[#allocation5 + $0x1098] sm:$0xff] }
 0x102   :  { %1429 = vmatprep.subr.mxu1 %v703_v49  ;;  %1353 = vmatpush1.msra.mxu0 %v510_v50  ;;  %v799_v49 = vld [vmem:[#allocation5 + $0x1698] sm:$0xff]  ;;  %v606_v50 = vld [vmem:[#allocation5 + $0x1090] sm:$0xff] }
 0x103   :  { %1430 = vmatpush1.msra.mxu1 %v702_v51  ;;  %1354 = vmatprep.subr.mxu0 %v505_v52  ;;  %v798_v51 = vld [vmem:[#allocation5 + $0x1690] sm:$0xff]  ;;  %v601_v52 = vld [vmem:[#allocation5 + $0x1068] sm:$0xff] }
 0x104   :  { %1431 = vmatprep.subr.mxu1 %v697_v53  ;;  %1355 = vmatpush1.msra.mxu0 %v504_v54  ;;  %v793_v53 = vld [vmem:[#allocation5 + $0x1668] sm:$0xff]  ;;  %v600_v54 = vld [vmem:[#allocation5 + $0x1060] sm:$0xff] }
 0x105   :  { %1432 = vmatpush1.msra.mxu1 %v696_v55  ;;  %1356 = vmatprep.subr.mxu0 %v499_v56  ;;  %v792_v55 = vld [vmem:[#allocation5 + $0x1660] sm:$0xff]  ;;  %v595_v56 = vld [vmem:[#allocation5 + $0x1038] sm:$0xff] }
 0x106   :  { %1433 = vmatprep.subr.mxu1 %v691_v57  ;;  %1357 = vmatpush1.msra.mxu0 %v498_v58  ;;  %v787_v57 = vld [vmem:[#allocation5 + $0x1638] sm:$0xff]  ;;  %v594_v58 = vld [vmem:[#allocation5 + $0x1030] sm:$0xff] }
 0x107   :  { %1434 = vmatpush1.msra.mxu1 %v690_v59  ;;  %1358 = vmatprep.subr.mxu0 %v493_v60  ;;  %v786_v59 = vld [vmem:[#allocation5 + $0x1630] sm:$0xff]  ;;  %v589_v60 = vld [vmem:[#allocation5 + $0x1008] sm:$0xff] }
 0x108   :  { %1435 = vmatprep.subr.mxu1 %v685_v61  ;;  %1359 = vmatpush1.msra.mxu0 %v492_v62  ;;  %v781_v61 = vld [vmem:[#allocation5 + $0x1608] sm:$0xff]  ;;  %v588_v62 = vld [vmem:[#allocation5 + $0x1000] sm:$0xff] }
 0x109   :  { %1436 = vmatpush1.msra.mxu1 %v684_v63  ;;  %1360 = vmatprep.subr.mxu0 %v487_v0  ;;  %v780_v63 = vld [vmem:[#allocation5 + $0x1600] sm:$0xff]  ;;  %v583_v0 = vld [vmem:[#allocation5 + $0xfd8] sm:$0xff] }
 0x10a   :  { %1437 = vmatprep.subr.mxu1 %v679_v1  ;;  %1361 = vmatpush1.msra.mxu0 %v486_v2  ;;  %v775_v1 = vld [vmem:[#allocation5 + $0x15d8] sm:$0xff]  ;;  %v582_v2 = vld [vmem:[#allocation5 + $0xfd0] sm:$0xff] }
 0x10b   :  { %1438 = vmatpush1.msra.mxu1 %v678_v3  ;;  %1362 = vmatprep.subr.mxu0 %v481_v4  ;;  %v774_v3 = vld [vmem:[#allocation5 + $0x15d0] sm:$0xff]  ;;  %v577_v4 = vld [vmem:[#allocation5 + $0xfa8] sm:$0xff] }
 0x10c   :  { %1439 = vmatprep.subr.mxu1 %v673_v5  ;;  %1363 = vmatpush1.msra.mxu0 %v480_v6  ;;  %v769_v5 = vld [vmem:[#allocation5 + $0x15a8] sm:$0xff]  ;;  %v576_v6 = vld [vmem:[#allocation5 + $0xfa0] sm:$0xff] }
 0x10d   :  { %1440 = vmatpush1.msra.mxu1 %v672_v7  ;;  %1364 = vmatprep.subr.mxu0 %v475_v8  ;;  %v768_v7 = vld [vmem:[#allocation5 + $0x15a0] sm:$0xff]  ;;  %v571_v8 = vld [vmem:[#allocation5 + $0xf78] sm:$0xff] }
 0x10e   :  { %1441 = vmatprep.subr.mxu1 %v667_v9  ;;  %1365 = vmatpush1.msra.mxu0 %v474_v10  ;;  %v763_v9 = vld [vmem:[#allocation5 + $0x1578] sm:$0xff]  ;;  %v570_v10 = vld [vmem:[#allocation5 + $0xf70] sm:$0xff] }
 0x10f   :  { %1442 = vmatpush1.msra.mxu1 %v666_v11  ;;  %1366 = vmatprep.subr.mxu0 %v469_v12  ;;  %v762_v11 = vld [vmem:[#allocation5 + $0x1570] sm:$0xff]  ;;  %v1844_v12 = vld [vmem:[#allocation2 + $0x48] sm:$0xff] }
 0x110   :  { %1443 = vmatprep.subr.mxu1 %v661_v13  ;;  %1367 = vmatpush1.msra.mxu0 %v468_v14  ;;  %v565_v13 = vld [vmem:[#allocation5 + $0xf48] sm:$0xff]  ;;  %v1845_v14 = vld [vmem:[#allocation2 + $0x40] sm:$0xff] }
 0x111   :  { %1444 = vmatpush1.msra.mxu1 %v660_v15  ;;  %1368 = vmatprep.subr.mxu0 %v463_v16  ;;  %v757_v15 = vld [vmem:[#allocation5 + $0x1548] sm:$0xff]  ;;  %v564_v16 = vld [vmem:[#allocation5 + $0xf40] sm:$0xff] }
 0x112   :  { %1445 = vmatprep.subr.mxu1 %v655_v17  ;;  %1369 = vmatpush1.msra.mxu0 %v462_v18  ;;  %v756_v17 = vld [vmem:[#allocation5 + $0x1540] sm:$0xff]  ;;  %v1846_v18 = vld [vmem:[#allocation2 + $0x58] sm:$0xff] }
 0x113   :  { %1446 = vmatpush1.msra.mxu1 %v654_v19  ;;  %1370 = vmatprep.subr.mxu0 %v649_v20  ;;  %v559_v19 = vld [vmem:[#allocation5 + $0xf18] sm:$0xff] }
 0x114   :  { %1447 = vmatprep.subr.mxu1 %v841_v21  ;;  %1371 = vmatpush2.msra.mxu0 %v648_v22  ;;  %v751_v20 = vld [vmem:[#allocation5 + $0x1518] sm:$0xff]  ;;  %v1847_v21 = vld [vmem:[#allocation2 + $0x50] sm:$0xff] }
 0x115   :  { %1448 = vmatpush2.msra.mxu1 %v840_v23  ;;  %1372 = vmatprep.subr.mxu0 %v643_v24  ;;  %v558_v22 = vld [vmem:[#allocation5 + $0xf10] sm:$0xff]  ;;  %v171_v24 = vld [vmem:[#allocation5 + $0x2f8] sm:$0xff] }
 0x116   :  { %1449 = vmatprep.subr.mxu1 %v835_v25  ;;  %1373 = vmatpush2.msra.mxu0 %v642_v26  ;;  %v750_v23 = vld [vmem:[#allocation5 + $0x1510] sm:$0xff]  ;;  %v1848_v25 = vld [vmem:[#allocation2 + $0x28] sm:$0xff]  ;;  %v363_v26 = vld [vmem:[#allocation5 + $0x8f8] sm:$0xff] }
 0x117   :  { %1450 = vmatpush2.msra.mxu1 %v834_v27  ;;  %1374 = vmatprep.subr.mxu0 %v637_v28  ;;  %v1849_v27 = vld [vmem:[#allocation2 + $0x20] sm:$0xff]  ;;  %v170_v28 = vld [vmem:[#allocation5 + $0x2f0] sm:$0xff] }
 0x118   :  { %1451 = vmatprep.subr.mxu1 %v829_v29  ;;  %1375 = vmatpush2.msra.mxu0 %v636_v30  ;;  %v362_v29 = vld [vmem:[#allocation5 + $0x8f0] sm:$0xff]  ;;  %v1850_v30 = vld [vmem:[#allocation2 + $0x38] sm:$0xff] }
 0x119   :  { %1452 = vmatpush2.msra.mxu1 %v828_v31  ;;  %1376 = vmatprep.subr.mxu0 %v631_v32  ;;  %v165_v31 = vld [vmem:[#allocation5 + $0x2c8] sm:$0xff] }
 0x11a   :  { %1453 = vmatprep.subr.mxu1 %v823_v33  ;;  %1377 = vmatpush2.msra.mxu0 %v630_v34  ;;  %v357_v32 = vld [vmem:[#allocation5 + $0x8c8] sm:$0xff]  ;;  %v1851_v33 = vld [vmem:[#allocation2 + $0x30] sm:$0xff]  ;;  %v164_v34 = vld [vmem:[#allocation5 + $0x2c0] sm:$0xff] }
 0x11b   :  { %1454 = vmatpush2.msra.mxu1 %v822_v35  ;;  %1378 = vmatprep.subr.mxu0 %v625_v36  ;;  %v356_v35 = vld [vmem:[#allocation5 + $0x8c0] sm:$0xff]  ;;  %v159_v36 = vld [vmem:[#allocation5 + $0x298] sm:$0xff] }
 0x11c   :  { %1455 = vmatprep.subr.mxu1 %v817_v37  ;;  %1379 = vmatpush2.msra.mxu0 %v624_v38  ;;  %v351_v37 = vld [vmem:[#allocation5 + $0x898] sm:$0xff]  ;;  %v1852_v38 = vld [vmem:[#allocation2 + $0x68] sm:$0xff] }
 0x11d   :  { %1456 = vmatpush2.msra.mxu1 %v816_v39  ;;  %1380 = vmatprep.subr.mxu0 %v619_v40  ;;  %v158_v39 = vld [vmem:[#allocation5 + $0x290] sm:$0xff]  ;;  %v1853_v40 = vld [vmem:[#allocation2 + $0x60] sm:$0xff] }
 0x11e   :  { %1457 = vmatprep.subr.mxu1 %v811_v41  ;;  %1381 = vmatpush2.msra.mxu0 %v618_v42  ;;  %v350_v41 = vld [vmem:[#allocation5 + $0x890] sm:$0xff]  ;;  %v153_v42 = vld [vmem:[#allocation5 + $0x268] sm:$0xff] }
 0x11f   :  { %1458 = vmatpush2.msra.mxu1 %v810_v43  ;;  %1382 = vmatprep.subr.mxu0 %v613_v44  ;;  %v345_v43 = vld [vmem:[#allocation5 + $0x868] sm:$0xff]  ;;  %v1854_v44 = vld [vmem:[#allocation2 + $0x78] sm:$0xff] }
 0x120   :  { %1459 = vmatprep.subr.mxu1 %v805_v45  ;;  %1383 = vmatpush2.msra.mxu0 %v612_v46  ;;  %v152_v45 = vld [vmem:[#allocation5 + $0x260] sm:$0xff] }
 0x121   :  { %1460 = vmatpush2.msra.mxu1 %v804_v47  ;;  %1384 = vmatprep.subr.mxu0 %v607_v48  ;;  %v344_v46 = vld [vmem:[#allocation5 + $0x860] sm:$0xff]  ;;  %v147_v47 = vld [vmem:[#allocation5 + $0x238] sm:$0xff] }
 0x122   :  { %1461 = vmatprep.subr.mxu1 %v799_v49  ;;  %1385 = vmatpush2.msra.mxu0 %v606_v50  ;;  %v339_v48 = vld [vmem:[#allocation5 + $0x838] sm:$0xff]  ;;  %v1855_v49 = vld [vmem:[#allocation2 + $0x70] sm:$0xff] }
 0x123   :  { %1462 = vmatpush2.msra.mxu1 %v798_v51  ;;  %1386 = vmatprep.subr.mxu0 %v601_v52  ;;  %v146_v50 = vld [vmem:[#allocation5 + $0x230] sm:$0xff]  ;;  %v141_v52 = vld [vmem:[#allocation5 + $0x208] sm:$0xff] }
 0x124   :  { %1463 = vmatprep.subr.mxu1 %v793_v53  ;;  %1387 = vmatpush2.msra.mxu0 %v600_v54  ;;  %v338_v51 = vld [vmem:[#allocation5 + $0x830] sm:$0xff]  ;;  %v333_v53 = vld [vmem:[#allocation5 + $0x808] sm:$0xff]  ;;  %v140_v54 = vld [vmem:[#allocation5 + $0x200] sm:$0xff] }
 0x125   :  { %1464 = vmatpush2.msra.mxu1 %v792_v55  ;;  %1388 = vmatprep.subr.mxu0 %v595_v56  ;;  %v332_v55 = vld [vmem:[#allocation5 + $0x800] sm:$0xff]  ;;  %v135_v56 = vld [vmem:[#allocation5 + $0x1d8] sm:$0xff] }
 0x126   :  { %1465 = vmatprep.subr.mxu1 %v787_v57  ;;  %1389 = vmatpush2.msra.mxu0 %v594_v58  ;;  %v327_v57 = vld [vmem:[#allocation5 + $0x7d8] sm:$0xff]  ;;  %v134_v58 = vld [vmem:[#allocation5 + $0x1d0] sm:$0xff] }
 0x127   :  { %1466 = vmatpush2.msra.mxu1 %v786_v59  ;;  %1390 = vmatprep.subr.mxu0 %v589_v60  ;;  %v326_v59 = vld [vmem:[#allocation5 + $0x7d0] sm:$0xff]  ;;  %v129_v60 = vld [vmem:[#allocation5 + $0x1a8] sm:$0xff] }
 0x128   :  { %1467 = vmatprep.subr.mxu1 %v781_v61  ;;  %1391 = vmatpush2.msra.mxu0 %v588_v62  ;;  %v321_v61 = vld [vmem:[#allocation5 + $0x7a8] sm:$0xff]  ;;  %v128_v62 = vld [vmem:[#allocation5 + $0x1a0] sm:$0xff] }
 0x129   :  { %1468 = vmatpush2.msra.mxu1 %v780_v63  ;;  %1392 = vmatprep.subr.mxu0 %v583_v0  ;;  %v320_v63 = vld [vmem:[#allocation5 + $0x7a0] sm:$0xff]  ;;  %v123_v0 = vld [vmem:[#allocation5 + $0x178] sm:$0xff] }
 0x12a   :  { %1469 = vmatprep.subr.mxu1 %v775_v1  ;;  %1393 = vmatpush2.msra.mxu0 %v582_v2  ;;  %v315_v1 = vld [vmem:[#allocation5 + $0x778] sm:$0xff]  ;;  %v122_v2 = vld [vmem:[#allocation5 + $0x170] sm:$0xff] }
 0x12b   :  { %1470 = vmatpush2.msra.mxu1 %v774_v3  ;;  %1394 = vmatprep.subr.mxu0 %v577_v4  ;;  %v314_v3 = vld [vmem:[#allocation5 + $0x770] sm:$0xff]  ;;  %v117_v4 = vld [vmem:[#allocation5 + $0x148] sm:$0xff] }
 0x12c   :  { %1471 = vmatprep.subr.mxu1 %v769_v5  ;;  %1395 = vmatpush2.msra.mxu0 %v576_v6  ;;  %v309_v5 = vld [vmem:[#allocation5 + $0x748] sm:$0xff]  ;;  %v116_v6 = vld [vmem:[#allocation5 + $0x140] sm:$0xff] }
 0x12d   :  { %1472 = vmatpush2.msra.mxu1 %v768_v7  ;;  %1254 = vmatprep.mubr.f32.mxu0 %v1844_v12  ;;  %v308_v7 = vld [vmem:[#allocation5 + $0x740] sm:$0xff]  ;;  %v105_v12 = vld [vmem:[#allocation5 + $0xe8] sm:$0xff] }
 0x12e   :  { %1396 = vmatprep.subr.mxu0 %v571_v8  ;;  %1473 = vmatprep.subr.mxu1 %v763_v9  ;;  %v111_v8 = vld [vmem:[#allocation5 + $0x118] sm:$0xff] }
 0x12f   :  { %1255 = vmatmul.mubr.f32.gmra.mxu0 %v1845_v14  ;;  %1474 = vmatpush2.msra.mxu1 %v762_v11  ;;  %v303_v9 = vld [vmem:[#allocation5 + $0x718] sm:$0xff]  ;;  %v302_v11 = vld [vmem:[#allocation5 + $0x710] sm:$0xff]  ;;  %v104_v14 = vld [vmem:[#allocation5 + $0xe0] sm:$0xff] }
 0x130   :  { %1397 = vmatpush2.msra.mxu0 %v570_v10  ;;  %1331 = vmatprep.mubr.f32.mxu1 %v1846_v18  ;;  %v110_v10 = vld [vmem:[#allocation5 + $0x110] sm:$0xff] }
 0x131   :  { %1398 = vmatprep.subr.mxu0 %v565_v13  ;;  %1475 = vmatprep.subr.mxu1 %v757_v15  ;;  %v297_v13 = vld [vmem:[#allocation5 + $0x6e8] sm:$0xff]  ;;  %v296_v15 = vld [vmem:[#allocation5 + $0x6e0] sm:$0xff]  ;;  %v98_v18 = vld [vmem:[#allocation5 + $0xb0] sm:$0xff] }
 0x132   :  { %1332 = vmatmul.mubr.f32.gmra.mxu1 %v1847_v21  ;;  %1399 = vmatpush2.msra.mxu0 %v564_v16  ;;  %v99_v16 = vld [vmem:[#allocation5 + $0xb8] sm:$0xff]  ;;  %v285_v21 = vld [vmem:[#allocation5 + $0x688] sm:$0xff] }
 0x133   :  { %1476 = vmatpush2.msra.mxu1 %v756_v17  ;;  %1400 = vmatprep.subr.mxu0 %v559_v19  ;;  %v291_v17 = vld [vmem:[#allocation5 + $0x6b8] sm:$0xff]  ;;  %v290_v19 = vld [vmem:[#allocation5 + $0x6b0] sm:$0xff] }
 0x134   :  { %1477 = vmatprep.subr.mxu1 %v751_v20  ;;  %1401 = vmatpush2.msra.mxu0 %v558_v22  ;;  %v93_v20 = vld [vmem:[#allocation5 + $0x88] sm:$0xff]  ;;  %v92_v22 = vld [vmem:[#allocation5 + $0x80] sm:$0xff] }
 0x135   :  { %1402 = vmatprep.mubr.f32.mxu0 %v1848_v25  ;;  %1478 = vmatpush2.msra.mxu1 %v750_v23  ;;  %v284_v23 = vld [vmem:[#allocation5 + $0x680] sm:$0xff]  ;;  %v279_v25 = vld [vmem:[#allocation5 + $0x658] sm:$0xff] }
 0x136   :  { %1403 = vmatmul.mubr.f32.vlgmr.msra.gmra.mxu0 %v1849_v27  ;;  %1479 = vmatprep.mubr.f32.mxu1 %v1850_v30  ;;  %v278_v27 = vld [vmem:[#allocation5 + $0x650] sm:$0xff]  ;;  %v80_v30 = vld [vmem:[#allocation5 + $0x20] sm:$0xff] }
 0x137   :  { %1492 = vmatprep.subr.mxu0 %v171_v24  ;;  %1569 = vmatprep.subr.mxu1 %v363_v26  ;;  %v87_v24 = vld [vmem:[#allocation5 + $0x58] sm:$0xff]  ;;  %v86_v26 = vld [vmem:[#allocation5 + $0x50] sm:$0xff] }
 0x138   :  { %1480 = vmatmul.mubr.f32.vlgmr.msra.gmra.mxu1 %v1851_v33  ;;  %1493 = vmatpush1.msra.mxu0 %v170_v28  ;;  %v81_v28 = vld [vmem:[#allocation5 + $0x28] sm:$0xff]  ;;  %v459_v33 = vld [vmem:[#allocation5 + $0xbf8] sm:$0xff] }
 0x139   :  { %1570 = vmatpush1.msra.mxu1 %v362_v29  ;;  %1494 = vmatprep.subr.mxu0 %v165_v31  ;;  %v273_v29 = vld [vmem:[#allocation5 + $0x628] sm:$0xff]  ;;  %v272_v31 = vld [vmem:[#allocation5 + $0x620] sm:$0xff] }
 0x13a   :  { %1571 = vmatprep.subr.mxu1 %v357_v32  ;;  %1408 = vmatprep.mubr.f32.mxu0 %v1852_v38  ;;  %v267_v32 = vld [vmem:[#allocation5 + $0x5f8] sm:$0xff]  ;;  %v453_v38 = vld [vmem:[#allocation5 + $0xbc8] sm:$0xff] }
 0x13b   :  { %1495 = vmatpush1.msra.mxu0 %v164_v34  ;;  %1572 = vmatpush1.msra.mxu1 %v356_v35  ;;  %v266_v34 = vld [vmem:[#allocation5 + $0x5f0] sm:$0xff] }
 0x13c   :  { %1409 = vmatmul.mubr.f32.gmra.mxu0 %v1853_v40  ;;  %1496 = vmatprep.subr.mxu0 %v159_v36  ;;  %v458_v35 = vld [vmem:[#allocation5 + $0xbf0] sm:$0xff]  ;;  %v846_v36 = vlaneseq  ;;  %v452_v40 = vld [vmem:[#allocation5 + $0xbc0] sm:$0xff] }
 0x13d   :  { %1573 = vmatprep.subr.mxu1 %v351_v37  ;;  %1485 = vmatprep.mubr.f32.mxu1 %v1854_v44  ;;  %v261_v37 = vld [vmem:[#allocation5 + $0x5c8] sm:$0xff]  ;;  %v446_v44 = vld [vmem:[#allocation5 + $0xb90] sm:$0xff] }
 0x13e   :  { %1497 = vmatpush1.msra.mxu0 %v158_v39  ;;  %1574 = vmatpush1.msra.mxu1 %v350_v41  ;;  %v260_v39 = vld [vmem:[#allocation5 + $0x5c0] sm:$0xff]  ;;  %v255_v41 = vld [vmem:[#allocation5 + $0x598] sm:$0xff] }
 0x13f   :  { %1498 = vmatprep.subr.mxu0 %v153_v42  ;;  %1486 = vmatmul.mubr.f32.gmra.mxu1 %v1855_v49  ;;  %v447_v42 = vld [vmem:[#allocation5 + $0xb98] sm:$0xff]  ;;  %v440_v49 = vld [vmem:[#allocation5 + $0xb60] sm:$0xff] }
 0x140   :  { %1575 = vmatprep.subr.mxu1 %v345_v43  ;;  %1499 = vmatpush1.msra.mxu0 %v152_v45  ;;  %v254_v43 = vld [vmem:[#allocation5 + $0x590] sm:$0xff]  ;;  %v2002_v45 = vshrl.u32 %v846_v36, 7  ;;  %v195_v36 = vld [vmem:[#allocation5 + $0x3b8] sm:$0xff] }
 0x141   :  { %1576 = vmatpush1.msra.mxu1 %v344_v46  ;;  %1500 = vmatprep.subr.mxu0 %v147_v47  ;;  %v249_v46 = vld [vmem:[#allocation5 + $0x568] sm:$0xff] }
 0x142   :  { %1577 = vmatprep.subr.mxu1 %v339_v48  ;;  %1501 = vmatpush1.msra.mxu0 %v146_v50  ;;  %v441_v47 = vld [vmem:[#allocation5 + $0xb68] sm:$0xff]  ;;  %v248_v48 = vld [vmem:[#allocation5 + $0x560] sm:$0xff]  ;;  %v243_v50 = vld [vmem:[#allocation5 + $0x538] sm:$0xff] }
 0x143   :  { %1578 = vmatpush1.msra.mxu1 %v338_v51  ;;  %1502 = vmatprep.subr.mxu0 %v141_v52  ;;  %v435_v51 = vld [vmem:[#allocation5 + $0xb38] sm:$0xff]  ;;  %v242_v52 = vld [vmem:[#allocation5 + $0x530] sm:$0xff] }
 0x144   :  { %1579 = vmatprep.subr.mxu1 %v333_v53  ;;  %1503 = vmatpush1.msra.mxu0 %v140_v54  ;;  %v434_v53 = vld [vmem:[#allocation5 + $0xb30] sm:$0xff]  ;;  %v848_v54 = vsub.s32 0, %v2002_v45 }
 0x145   :  { %1580 = vmatpush1.msra.mxu1 %v332_v55  ;;  %1504 = vmatprep.subr.mxu0 %v135_v56  ;;  %v942_v55 = vpop.f32.mrf.mxu0  ;;  %v237_v56 = vld [vmem:[#allocation5 + $0x508] sm:$0xff] }
 0x146   :  { %1581 = vmatprep.subr.mxu1 %v327_v57  ;;  %1505 = vmatpush1.msra.mxu0 %v134_v58  ;;  %v429_v57 = vld [vmem:[#allocation5 + $0xb08] sm:$0xff]  ;;  %v2005_v58 = vld [vmem:[#allocation7] sm:$0x3f] }
 0x147   :  { %1582 = vmatpush1.msra.mxu1 %v326_v59  ;;  %1506 = vmatprep.subr.mxu0 %v129_v60  ;;  %v236_v59 = vld [vmem:[#allocation5 + $0x500] sm:$0xff] }
 0x148   :  { %1583 = vmatprep.subr.mxu1 %v321_v61  ;;  %1507 = vmatpush1.msra.mxu0 %v128_v62  ;;  %v428_v60 = vld [vmem:[#allocation5 + $0xb00] sm:$0xff]  ;;  %v852_v61 = vsub.s32 1, %v2002_v45  ;;  %v231_v62 = vld [vmem:[#allocation5 + $0x4d8] sm:$0xff] }
 0x149   :  { %1584 = vmatpush1.msra.mxu1 %v320_v63  ;;  %1508 = vmatprep.subr.mxu0 %v123_v0  ;;  %v423_v63 = vld [vmem:[#allocation5 + $0xad8] sm:$0xff]  ;;  %v1019_v0 = vpop.f32.mrf.mxu1 }
 0x14a   :  { %1585 = vmatprep.subr.mxu1 %v315_v1  ;;  %1509 = vmatpush1.msra.mxu0 %v122_v2  ;;  %v230_v1 = vld [vmem:[#allocation5 + $0x4d0] sm:$0xff] }
 0x14b   :  { %1586 = vmatpush1.msra.mxu1 %v314_v3  ;;  %1510 = vmatprep.subr.mxu0 %v117_v4  ;;  %v422_v2 = vld [vmem:[#allocation5 + $0xad0] sm:$0xff]  ;;  %v849_v3 = vrot.slane %v2005_v58, %v848_v54  ;;  %v944_v4 = vpop.f32.mrf.mxu0  ;;  %v375_v54 = vld [vmem:[#allocation5 + $0x958] sm:$0xff] }
 0x14c   :  { %1587 = vmatprep.subr.mxu1 %v309_v5  ;;  %1511 = vmatpush1.msra.mxu0 %v116_v6  ;;  %v225_v5 = vld [vmem:[#allocation5 + $0x4a8] sm:$0xff] }
 0x14d   :  { %1588 = vmatpush1.msra.mxu1 %v308_v7  ;;  %1512 = vmatprep.subr.mxu0 %v111_v8  ;;  %v417_v6 = vld [vmem:[#allocation5 + $0xaa8] sm:$0xff]  ;;  %v224_v7 = vld [vmem:[#allocation5 + $0x4a0] sm:$0xff] }
 0x14e   :  { %1589 = vmatprep.subr.mxu1 %v303_v9  ;;  %1513 = vmatpush1.msra.mxu0 %v110_v10  ;;  %v416_v8 = vld [vmem:[#allocation5 + $0xaa0] sm:$0xff]  ;;  %v853_v9 = vrot.slane %v2005_v58, %v852_v61  ;;  %v219_v10 = vld [vmem:[#allocation5 + $0x478] sm:$0xff]  ;;  %v177_v61 = vld [vmem:[#allocation5 + $0x328] sm:$0xff] }
 0x14f   :  { %1590 = vmatpush1.msra.mxu1 %v302_v11  ;;  %1514 = vmatprep.subr.mxu0 %v105_v12  ;;  %v411_v11 = vld [vmem:[#allocation5 + $0xa78] sm:$0xff] }
 0x150   :  { %1591 = vmatprep.subr.mxu1 %v297_v13  ;;  %1515 = vmatpush1.msra.mxu0 %v104_v14  ;;  %v1021_v13 = vpop.f32.mrf.mxu1  ;;  %v218_v14 = vld [vmem:[#allocation5 + $0x470] sm:$0xff] }
 0x151   :  { %1592 = vmatpush1.msra.mxu1 %v296_v15  ;;  %1516 = vmatprep.subr.mxu0 %v99_v16  ;;  %v410_v15 = vld [vmem:[#allocation5 + $0xa70] sm:$0xff]  ;;  %v943_v16 = vadd.f32 %v942_v55, %v849_v3 }
 0x152   :  { %1593 = vmatprep.subr.mxu1 %v291_v17  ;;  %1517 = vmatpush1.msra.mxu0 %v98_v18  ;;  %v213_v17 = vld [vmem:[#allocation5 + $0x448] sm:$0xff] }
 0x153   :  { %1594 = vmatpush1.msra.mxu1 %v290_v19  ;;  %1518 = vmatprep.subr.mxu0 %v93_v20  ;;  %v405_v18 = vld [vmem:[#allocation5 + $0xa48] sm:$0xff]  ;;  %v212_v19 = vld [vmem:[#allocation5 + $0x440] sm:$0xff] }
 0x154   :  { %1595 = vmatprep.subr.mxu1 %v285_v21  ;;  %1519 = vmatpush1.msra.mxu0 %v92_v22  ;;  %v404_v20 = vld [vmem:[#allocation5 + $0xa40] sm:$0xff] }
 0x155   :  { %1596 = vmatpush1.msra.mxu1 %v284_v23  ;;  %1520 = vmatprep.subr.mxu0 %v87_v24  ;;  %v945_v23 = vadd.f32 %v944_v4, %v853_v9  ;;  %v207_v24 = vld [vmem:[#allocation5 + $0x418] sm:$0xff] }
 0x156   :  { %1597 = vmatprep.subr.mxu1 %v279_v25  ;;  %1521 = vmatpush1.msra.mxu0 %v86_v26  ;;  %v399_v25 = vld [vmem:[#allocation5 + $0xa18] sm:$0xff]  ;;  %v206_v26 = vld [vmem:[#allocation5 + $0x410] sm:$0xff] }
 0x157   :  { %1598 = vmatpush1.msra.mxu1 %v278_v27  ;;  %1522 = vmatprep.subr.mxu0 %v81_v28  ;;  %v398_v27 = vld [vmem:[#allocation5 + $0xa10] sm:$0xff] }
 0x158   :  { %1599 = vmatprep.subr.mxu1 %v273_v29  ;;  %1523 = vmatpush1.msra.mxu0 %v80_v30  ;;  %v1020_v29 = vadd.f32 %v1019_v0, %v943_v16  ;;  %v201_v30 = vld [vmem:[#allocation5 + $0x3e8] sm:$0xff] }
 0x159   :  { %1600 = vmatpush1.msra.mxu1 %v272_v31  ;;  %1524 = vmatprep.subr.mxu0 %v267_v32  ;;  %v393_v31 = vld [vmem:[#allocation5 + $0x9e8] sm:$0xff]  ;;  %v200_v32 = vld [vmem:[#allocation5 + $0x3e0] sm:$0xff] }
 0x15a   :  { %1601 = vmatprep.subr.mxu1 %v459_v33  ;;  %1525 = vmatpush2.msra.mxu0 %v266_v34  ;;  %v392_v33 = vld [vmem:[#allocation5 + $0x9e0] sm:$0xff]  ;;  %v741_v16 = vld [vmem:[#allocation5 + $0x14c8] sm:$0xff] }
 0x15b   :  { %1602 = vmatpush2.msra.mxu1 %v458_v35  ;;  %1526 = vmatprep.subr.mxu0 %v261_v37  ;;  %v1022_v35 = vadd.f32 %v1021_v13, %v945_v23  ;;  %v387_v37 = vld [vmem:[#allocation5 + $0x9b8] sm:$0xff]  ;;  %v542_v23 = vld [vmem:[#allocation5 + $0xe90] sm:$0xff] }
 0x15c   :  { %1603 = vmatprep.subr.mxu1 %v453_v38  ;;  %1527 = vmatpush2.msra.mxu0 %v260_v39 }
 0x15d   :  { %1604 = vmatpush2.msra.mxu1 %v452_v40  ;;  %1528 = vmatprep.subr.mxu0 %v255_v41  ;;  %v194_v40 = vld [vmem:[#allocation5 + $0x3b0] sm:$0xff] }
 0x15e   :  { %1605 = vmatprep.subr.mxu1 %v447_v42  ;;  %1529 = vmatpush2.msra.mxu0 %v254_v43  ;;  %v386_v41 = vld [vmem:[#allocation5 + $0x9b0] sm:$0xff] }
 0x15f   :  { %1606 = vmatpush2.msra.mxu1 %v446_v44  ;;  %1530 = vmatprep.subr.mxu0 %v249_v46  ;;  %v189_v44 = vld [vmem:[#allocation5 + $0x388] sm:$0xff] }
 0x160   :  { %1607 = vmatprep.subr.mxu1 %v441_v47  ;;  %1531 = vmatpush2.msra.mxu0 %v248_v48  ;;  %v381_v46 = vld [vmem:[#allocation5 + $0x988] sm:$0xff] }
 0x161   :  { %1608 = vmatpush2.msra.mxu1 %v440_v49  ;;  %1532 = vmatprep.subr.mxu0 %v243_v50  ;;  %v188_v50 = vld [vmem:[#allocation5 + $0x380] sm:$0xff] }
 0x162   :  { %1609 = vmatprep.subr.mxu1 %v435_v51  ;;  %1533 = vmatpush2.msra.mxu0 %v242_v52  ;;  %v380_v51 = vld [vmem:[#allocation5 + $0x980] sm:$0xff] }
 0x163   :  { %1610 = vmatpush2.msra.mxu1 %v434_v53  ;;  %1534 = vmatprep.subr.mxu0 %v237_v56  ;;  %v183_v53 = vld [vmem:[#allocation5 + $0x358] sm:$0xff] }
 0x164   :  { %1611 = vmatprep.subr.mxu1 %v429_v57  ;;  %1535 = vmatpush2.msra.mxu0 %v236_v59  ;;  %v182_v57 = vld [vmem:[#allocation5 + $0x350] sm:$0xff] }
 0x165   :  { %1612 = vmatpush2.msra.mxu1 %v428_v60  ;;  %1536 = vmatprep.subr.mxu0 %v231_v62  ;;  %v374_v59 = vld [vmem:[#allocation5 + $0x950] sm:$0xff]  ;;  %v369_v62 = vld [vmem:[#allocation5 + $0x928] sm:$0xff] }
 0x166   :  { %1613 = vmatprep.subr.mxu1 %v423_v63  ;;  %1537 = vmatpush2.msra.mxu0 %v230_v1  ;;  %v176_v1 = vld [vmem:[#allocation5 + $0x320] sm:$0xff] }
 0x167   :  { %1614 = vmatpush2.msra.mxu1 %v422_v2  ;;  %v948_v12 = vpop.f32.mrf.mxu0  ;;  %1538 = vmatprep.subr.mxu0 %v225_v5  ;;  %v555_v5 = vld [vmem:[#allocation5 + $0xef8] sm:$0xff] }
 0x168   :  { %1615 = vmatprep.subr.mxu1 %v417_v6  ;;  %1539 = vmatpush2.msra.mxu0 %v224_v7  ;;  %v949_v38 = vadd.f32 %v948_v12, %v849_v3  ;;  %v368_v3 = vld [vmem:[#allocation5 + $0x920] sm:$0xff]  ;;  %v1856_v7 = vld [vmem:[#allocation2 + $0x8] sm:$0xff]  ;;  %v746_v12 = vld [vmem:[#allocation5 + $0x14f0] sm:$0xff] }
 0x169   :  { %1616 = vmatpush2.msra.mxu1 %v416_v8  ;;  %1540 = vmatprep.subr.mxu0 %v219_v10  ;;  %v950_v21 = vpop.f32.mrf.mxu0  ;;  %v747_v8 = vld [vmem:[#allocation5 + $0x14f8] sm:$0xff]  ;;  %v1857_v10 = vld [vmem:[#allocation2] sm:$0xff] }
 0x16a   :  { %1617 = vmatprep.subr.mxu1 %v411_v11  ;;  %v1025_v22 = vpop.f32.mrf.mxu1  ;;  %1541 = vmatpush2.msra.mxu0 %v218_v14  ;;  %v951_v47 = vadd.f32 %v950_v21, %v853_v9  ;;  %v554_v11 = vld [vmem:[#allocation5 + $0xef0] sm:$0xff]  ;;  %v1858_v14 = vld [vmem:[#allocation2 + $0x18] sm:$0xff] }
 0x16b   :  { %1618 = vmatpush2.msra.mxu1 %v410_v15  ;;  %1542 = vmatprep.subr.mxu0 %v213_v17  ;;  %v1026_v55 = vadd.f32 %v1025_v22, %v949_v38  ;;  %v549_v15 = vld [vmem:[#allocation5 + $0xec8] sm:$0xff]  ;;  %v543_v21 = vld [vmem:[#allocation5 + $0xe98] sm:$0xff] }
 0x16c   :  { %1619 = vmatprep.subr.mxu1 %v405_v18  ;;  %v1027_v28 = vpop.f32.mrf.mxu1  ;;  %1543 = vmatpush2.msra.mxu0 %v212_v19  ;;  %v1859_v18 = vld [vmem:[#allocation2 + $0x10] sm:$0xff]  ;;  %v548_v19 = vld [vmem:[#allocation5 + $0xec0] sm:$0xff]  ;;  %v735_v22 = vld [vmem:[#allocation5 + $0x1498] sm:$0xff] }
 0x16d   :  { %1620 = vmatpush2.msra.mxu1 %v404_v20  ;;  %1544 = vmatprep.subr.mxu0 %v207_v24  ;;  %v1028_v63 = vadd.f32 %v1027_v28, %v951_v47  ;;  %v740_v20 = vld [vmem:[#allocation5 + $0x14c0] sm:$0xff]  ;;  %v734_v24 = vld [vmem:[#allocation5 + $0x1490] sm:$0xff]  ;;  %v711_v38 = vld [vmem:[#allocation5 + $0x13d8] sm:$0xff] }
 0x16e   :  { %1621 = vmatprep.subr.mxu1 %v399_v25  ;;  %v1096_v34 = vpop.f32.mrf.mxu0  ;;  %1545 = vmatpush2.msra.mxu0 %v206_v26  ;;  %v537_v25 = vld [vmem:[#allocation5 + $0xe68] sm:$0xff]  ;;  %v728_v28 = vld [vmem:[#allocation5 + $0x1460] sm:$0xff]  ;;  %v699_v47 = vld [vmem:[#allocation5 + $0x1378] sm:$0xff] }
 0x16f   :  { %1622 = vmatpush2.msra.mxu1 %v398_v27  ;;  %v1097_v39 = vadd.f32 %v1096_v34, %v1020_v29  ;;  %1546 = vmatprep.subr.mxu0 %v201_v30  ;;  %v729_v26 = vld [vmem:[#allocation5 + $0x1468] sm:$0xff]  ;;  %v536_v27 = vld [vmem:[#allocation5 + $0xe60] sm:$0xff]  ;;  %v531_v29 = vld [vmem:[#allocation5 + $0xe38] sm:$0xff] }
 0x170   :  { %1623 = vmatprep.subr.mxu1 %v393_v31  ;;  %v1173_v42 = vpop.f32.mrf.mxu1  ;;  %v1098_v43 = vpop.f32.mrf.mxu0  ;;  %1547 = vmatpush2.msra.mxu0 %v200_v32  ;;  %v723_v30 = vld [vmem:[#allocation5 + $0x1438] sm:$0xff]  ;;  %v530_v31 = vld [vmem:[#allocation5 + $0xe30] sm:$0xff]  ;;  %v717_v34 = vld [vmem:[#allocation5 + $0x1408] sm:$0xff] }
 0x171   :  { %1624 = vmatpush2.msra.mxu1 %v392_v33  ;;  %v1174_v48 = vadd.f32 %v1173_v42, %v1097_v39  ;;  %v1099_v49 = vadd.f32 %v1098_v43, %v1022_v35  ;;  %1548 = vmatprep.subr.mxu0 %v195_v36  ;;  %v722_v32 = vld [vmem:[#allocation5 + $0x1430] sm:$0xff]  ;;  %v525_v33 = vld [vmem:[#allocation5 + $0xe08] sm:$0xff]  ;;  %v524_v35 = vld [vmem:[#allocation5 + $0xe00] sm:$0xff] }
 0x172   :  { %1625 = vmatprep.subr.mxu1 %v387_v37  ;;  %v1175_v52 = vpop.f32.mrf.mxu1  ;;  %1549 = vmatpush2.msra.mxu0 %v194_v40  ;;  %v716_v36 = vld [vmem:[#allocation5 + $0x1400] sm:$0xff]  ;;  %v519_v37 = vld [vmem:[#allocation5 + $0xdd8] sm:$0xff]  ;;  %v518_v39 = vld [vmem:[#allocation5 + $0xdd0] sm:$0xff] }
 0x173   :  { %1626 = vmatpush2.msra.mxu1 %v386_v41  ;;  %1800 = vst [vmem:[#allocation8] sm:$0xff] %v1174_v48  ;;  %v1176_v56 = vadd.f32 %v1175_v52, %v1099_v49  ;;  %1550 = vmatprep.subr.mxu0 %v189_v44  ;;  %v710_v40 = vld [vmem:[#allocation5 + $0x13d0] sm:$0xff]  ;;  %v513_v41 = vld [vmem:[#allocation5 + $0xda8] sm:$0xff]  ;;  %v512_v43 = vld [vmem:[#allocation5 + $0xda0] sm:$0xff] }
 0x174   :  { %1627 = vmatprep.subr.mxu1 %v381_v46  ;;  %v1102_v60 = vpop.f32.mrf.mxu0  ;;  %1551 = vmatpush2.msra.mxu0 %v188_v50  ;;  %v705_v42 = vld [vmem:[#allocation5 + $0x13a8] sm:$0xff]  ;;  %v704_v44 = vld [vmem:[#allocation5 + $0x13a0] sm:$0xff]  ;;  %v507_v46 = vld [vmem:[#allocation5 + $0xd78] sm:$0xff] }
 0x175   :  { %1628 = vmatpush2.msra.mxu1 %v380_v51  ;;  %1801 = vst [vmem:[#allocation8 + $0x8] sm:$0xff] %v1176_v56  ;;  %v1103_v0 = vadd.f32 %v1102_v60, %v1026_v55  ;;  %1552 = vmatprep.subr.mxu0 %v183_v53  ;;  %v506_v48 = vld [vmem:[#allocation5 + $0xd70] sm:$0xff]  ;;  %v501_v50 = vld [vmem:[#allocation5 + $0xd48] sm:$0xff]  ;;  %v500_v52 = vld [vmem:[#allocation5 + $0xd40] sm:$0xff] }
 0x176   :  { %1629 = vmatprep.subr.mxu1 %v375_v54  ;;  %v1104_v2 = vpop.f32.mrf.mxu0  ;;  %1553 = vmatpush2.msra.mxu0 %v182_v57  ;;  %v698_v49 = vld [vmem:[#allocation5 + $0x1370] sm:$0xff]  ;;  %v693_v51 = vld [vmem:[#allocation5 + $0x1348] sm:$0xff]  ;;  %v692_v53 = vld [vmem:[#allocation5 + $0x1340] sm:$0xff] }
 0x177   :  { %1630 = vmatpush2.msra.mxu1 %v374_v59  ;;  %v1105_v4 = vadd.f32 %v1104_v2, %v1028_v63  ;;  %1554 = vmatprep.subr.mxu0 %v177_v61  ;;  %v1179_v6 = vpop.f32.mrf.mxu1  ;;  %v495_v54 = vld [vmem:[#allocation5 + $0xd18] sm:$0xff]  ;;  %v494_v56 = vld [vmem:[#allocation5 + $0xd10] sm:$0xff]  ;;  %v489_v59 = vld [vmem:[#allocation5 + $0xce8] sm:$0xff] }
 0x178   :  { %1631 = vmatprep.subr.mxu1 %v369_v62  ;;  %1555 = vmatpush2.msra.mxu0 %v176_v1  ;;  %v1180_v9 = vadd.f32 %v1179_v6, %v1103_v0  ;;  %v687_v55 = vld [vmem:[#allocation5 + $0x1318] sm:$0xff]  ;;  %v686_v57 = vld [vmem:[#allocation5 + $0x1310] sm:$0xff]  ;;  %v681_v60 = vld [vmem:[#allocation5 + $0x12e8] sm:$0xff] }
 0x179   :  { %1556 = vmatprep.mubr.f32.mxu0 %v1856_v7  ;;  %1632 = vmatpush2.msra.mxu1 %v368_v3  ;;  %v1181_v13 = vpop.f32.mrf.mxu1  ;;  %v488_v61 = vld [vmem:[#allocation5 + $0xce0] sm:$0xff]  ;;  %v483_v63 = vld [vmem:[#allocation5 + $0xcb8] sm:$0xff]  ;;  %v482_v1 = vld [vmem:[#allocation5 + $0xcb0] sm:$0xff] }
 0x17a   :  { %1557 = vmatmul.mubr.f32.vlgmr.msra.gmra.mxu0 %v1857_v10  ;;  %1633 = vmatprep.mubr.f32.mxu1 %v1858_v14  ;;  %1806 = vst [vmem:[#allocation8 + $0x30] sm:$0xff] %v1180_v9  ;;  %v1182_v17 = vadd.f32 %v1181_v13, %v1105_v4  ;;  %v680_v62 = vld [vmem:[#allocation5 + $0x12e0] sm:$0xff]  ;;  %v675_v0 = vld [vmem:[#allocation5 + $0x12b8] sm:$0xff]  ;;  %v674_v2 = vld [vmem:[#allocation5 + $0x12b0] sm:$0xff] }
 0x17b   :  { %1646 = vmatprep.subr.mxu0 %v555_v5  ;;  %1723 = vmatprep.subr.mxu1 %v747_v8  ;;  %v477_v3 = vld [vmem:[#allocation5 + $0xc88] sm:$0xff]  ;;  %v476_v5 = vld [vmem:[#allocation5 + $0xc80] sm:$0xff]  ;;  %v471_v7 = vld [vmem:[#allocation5 + $0xc58] sm:$0xff] }
 0x17c   :  { %1634 = vmatmul.mubr.f32.vlgmr.msra.gmra.mxu1 %v1859_v18  ;;  %1647 = vmatpush1.msra.mxu0 %v554_v11  ;;  %1807 = vst [vmem:[#allocation8 + $0x38] sm:$0xff] %v1182_v17  ;;  %v669_v4 = vld [vmem:[#allocation5 + $0x1288] sm:$0xff]  ;;  %v668_v6 = vld [vmem:[#allocation5 + $0x1280] sm:$0xff]  ;;  %v663_v8 = vld [vmem:[#allocation5 + $0x1258] sm:$0xff] }
 0x17d   :  { %1724 = vmatpush1.msra.mxu1 %v746_v12  ;;  %1648 = vmatprep.subr.mxu0 %v549_v15  ;;  %v470_v9 = vld [vmem:[#allocation5 + $0xc50] sm:$0xff]  ;;  %v465_v11 = vld [vmem:[#allocation5 + $0xc28] sm:$0xff]  ;;  %v464_v13 = vld [vmem:[#allocation5 + $0xc20] sm:$0xff] }
 0x17e   :  { %1725 = vmatprep.subr.mxu1 %v741_v16  ;;  %1649 = vmatpush1.msra.mxu0 %v548_v19  ;;  %v662_v10 = vld [vmem:[#allocation5 + $0x1250] sm:$0xff]  ;;  %v657_v12 = vld [vmem:[#allocation5 + $0x1228] sm:$0xff]  ;;  %v656_v14 = vld [vmem:[#allocation5 + $0x1220] sm:$0xff] }
 0x17f   :  { %1726 = vmatpush1.msra.mxu1 %v740_v20  ;;  %1650 = vmatprep.subr.mxu0 %v543_v21  ;;  %v651_v15 = vld [vmem:[#allocation5 + $0x11f8] sm:$0xff]  ;;  %v650_v17 = vld [vmem:[#allocation5 + $0x11f0] sm:$0xff]  ;;  %v645_v19 = vld [vmem:[#allocation5 + $0x11c8] sm:$0xff] }
 0x180   :  { %1727 = vmatprep.subr.mxu1 %v735_v22  ;;  %1651 = vmatpush1.msra.mxu0 %v542_v23  ;;  %v843_v16 = vld [vmem:[#allocation5 + $0x17f8] sm:$0xff]  ;;  %v842_v18 = vld [vmem:[#allocation5 + $0x17f0] sm:$0xff]  ;;  %v837_v20 = vld [vmem:[#allocation5 + $0x17c8] sm:$0xff] }
 0x181   :  { %1728 = vmatpush1.msra.mxu1 %v734_v24  ;;  %1652 = vmatprep.subr.mxu0 %v537_v25  ;;  %v644_v21 = vld [vmem:[#allocation5 + $0x11c0] sm:$0xff]  ;;  %v639_v23 = vld [vmem:[#allocation5 + $0x1198] sm:$0xff]  ;;  %v638_v25 = vld [vmem:[#allocation5 + $0x1190] sm:$0xff] }
 0x182   :  { %1729 = vmatprep.subr.mxu1 %v729_v26  ;;  %1653 = vmatpush1.msra.mxu0 %v536_v27  ;;  %v836_v22 = vld [vmem:[#allocation5 + $0x17c0] sm:$0xff]  ;;  %v831_v24 = vld [vmem:[#allocation5 + $0x1798] sm:$0xff]  ;;  %v830_v26 = vld [vmem:[#allocation5 + $0x1790] sm:$0xff] }
 0x183   :  { %1730 = vmatpush1.msra.mxu1 %v728_v28  ;;  %1654 = vmatprep.subr.mxu0 %v531_v29  ;;  %v633_v27 = vld [vmem:[#allocation5 + $0x1168] sm:$0xff]  ;;  %v632_v29 = vld [vmem:[#allocation5 + $0x1160] sm:$0xff] }
 0x184   :  { %1731 = vmatprep.subr.mxu1 %v723_v30  ;;  %1655 = vmatpush1.msra.mxu0 %v530_v31  ;;  %v825_v28 = vld [vmem:[#allocation5 + $0x1768] sm:$0xff]  ;;  %v824_v30 = vld [vmem:[#allocation5 + $0x1760] sm:$0xff]  ;;  %v627_v31 = vld [vmem:[#allocation5 + $0x1138] sm:$0xff] }
 0x185   :  { %1732 = vmatpush1.msra.mxu1 %v722_v32  ;;  %1656 = vmatprep.subr.mxu0 %v525_v33  ;;  %v819_v32 = vld [vmem:[#allocation5 + $0x1738] sm:$0xff]  ;;  %v626_v33 = vld [vmem:[#allocation5 + $0x1130] sm:$0xff] }
 0x186   :  { %1733 = vmatprep.subr.mxu1 %v717_v34  ;;  %1657 = vmatpush1.msra.mxu0 %v524_v35  ;;  %v818_v34 = vld [vmem:[#allocation5 + $0x1730] sm:$0xff]  ;;  %v621_v35 = vld [vmem:[#allocation5 + $0x1108] sm:$0xff] }
 0x187   :  { %1734 = vmatpush1.msra.mxu1 %v716_v36  ;;  %1658 = vmatprep.subr.mxu0 %v519_v37  ;;  %v813_v36 = vld [vmem:[#allocation5 + $0x1708] sm:$0xff]  ;;  %v620_v37 = vld [vmem:[#allocation5 + $0x1100] sm:$0xff] }
 0x188   :  { %1735 = vmatprep.subr.mxu1 %v711_v38  ;;  %1659 = vmatpush1.msra.mxu0 %v518_v39  ;;  %v812_v38 = vld [vmem:[#allocation5 + $0x1700] sm:$0xff]  ;;  %v615_v39 = vld [vmem:[#allocation5 + $0x10d8] sm:$0xff] }
 0x189   :  { %1736 = vmatpush1.msra.mxu1 %v710_v40  ;;  %1660 = vmatprep.subr.mxu0 %v513_v41  ;;  %v807_v40 = vld [vmem:[#allocation5 + $0x16d8] sm:$0xff]  ;;  %v614_v41 = vld [vmem:[#allocation5 + $0x10d0] sm:$0xff] }
 0x18a   :  { %1737 = vmatprep.subr.mxu1 %v705_v42  ;;  %1661 = vmatpush1.msra.mxu0 %v512_v43  ;;  %v806_v42 = vld [vmem:[#allocation5 + $0x16d0] sm:$0xff]  ;;  %v609_v43 = vld [vmem:[#allocation5 + $0x10a8] sm:$0xff] }
 0x18b   :  { %1738 = vmatpush1.msra.mxu1 %v704_v44  ;;  %1662 = vmatprep.subr.mxu0 %v507_v46  ;;  %v801_v44 = vld [vmem:[#allocation5 + $0x16a8] sm:$0xff]  ;;  %v608_v46 = vld [vmem:[#allocation5 + $0x10a0] sm:$0xff] }
 0x18c   :  { %1739 = vmatprep.subr.mxu1 %v699_v47  ;;  %1663 = vmatpush1.msra.mxu0 %v506_v48  ;;  %v800_v47 = vld [vmem:[#allocation5 + $0x16a0] sm:$0xff]  ;;  %v603_v48 = vld [vmem:[#allocation5 + $0x1078] sm:$0xff] }
 0x18d   :  { %1740 = vmatpush1.msra.mxu1 %v698_v49  ;;  %1664 = vmatprep.subr.mxu0 %v501_v50  ;;  %v795_v49 = vld [vmem:[#allocation5 + $0x1678] sm:$0xff]  ;;  %v602_v50 = vld [vmem:[#allocation5 + $0x1070] sm:$0xff] }
 0x18e   :  { %1741 = vmatprep.subr.mxu1 %v693_v51  ;;  %1665 = vmatpush1.msra.mxu0 %v500_v52  ;;  %v794_v51 = vld [vmem:[#allocation5 + $0x1670] sm:$0xff]  ;;  %v597_v52 = vld [vmem:[#allocation5 + $0x1048] sm:$0xff] }
 0x18f   :  { %1742 = vmatpush1.msra.mxu1 %v692_v53  ;;  %1666 = vmatprep.subr.mxu0 %v495_v54  ;;  %v789_v53 = vld [vmem:[#allocation5 + $0x1648] sm:$0xff]  ;;  %v596_v54 = vld [vmem:[#allocation5 + $0x1040] sm:$0xff] }
 0x190   :  { %1743 = vmatprep.subr.mxu1 %v687_v55  ;;  %1667 = vmatpush1.msra.mxu0 %v494_v56  ;;  %v788_v55 = vld [vmem:[#allocation5 + $0x1640] sm:$0xff]  ;;  %v591_v56 = vld [vmem:[#allocation5 + $0x1018] sm:$0xff] }
 0x191   :  { %1744 = vmatpush1.msra.mxu1 %v686_v57  ;;  %1668 = vmatprep.subr.mxu0 %v489_v59  ;;  %v783_v57 = vld [vmem:[#allocation5 + $0x1618] sm:$0xff]  ;;  %v590_v59 = vld [vmem:[#allocation5 + $0x1010] sm:$0xff] }
 0x192   :  { %1745 = vmatprep.subr.mxu1 %v681_v60  ;;  %1669 = vmatpush1.msra.mxu0 %v488_v61  ;;  %v782_v60 = vld [vmem:[#allocation5 + $0x1610] sm:$0xff]  ;;  %v585_v61 = vld [vmem:[#allocation5 + $0xfe8] sm:$0xff] }
 0x193   :  { %1746 = vmatpush1.msra.mxu1 %v680_v62  ;;  %1670 = vmatprep.subr.mxu0 %v483_v63  ;;  %v777_v62 = vld [vmem:[#allocation5 + $0x15e8] sm:$0xff]  ;;  %v584_v63 = vld [vmem:[#allocation5 + $0xfe0] sm:$0xff] }
 0x194   :  { %1747 = vmatprep.subr.mxu1 %v675_v0  ;;  %1671 = vmatpush1.msra.mxu0 %v482_v1  ;;  %v776_v0 = vld [vmem:[#allocation5 + $0x15e0] sm:$0xff]  ;;  %v579_v1 = vld [vmem:[#allocation5 + $0xfb8] sm:$0xff] }
 0x195   :  { %1748 = vmatpush1.msra.mxu1 %v674_v2  ;;  %1672 = vmatprep.subr.mxu0 %v477_v3  ;;  %v771_v2 = vld [vmem:[#allocation5 + $0x15b8] sm:$0xff]  ;;  %v578_v3 = vld [vmem:[#allocation5 + $0xfb0] sm:$0xff] }
 0x196   :  { %1749 = vmatprep.subr.mxu1 %v669_v4  ;;  %1673 = vmatpush1.msra.mxu0 %v476_v5  ;;  %v770_v4 = vld [vmem:[#allocation5 + $0x15b0] sm:$0xff]  ;;  %v573_v5 = vld [vmem:[#allocation5 + $0xf88] sm:$0xff] }
 0x197   :  { %1750 = vmatpush1.msra.mxu1 %v668_v6  ;;  %1674 = vmatprep.subr.mxu0 %v471_v7  ;;  %v765_v6 = vld [vmem:[#allocation5 + $0x1588] sm:$0xff] }
 0x198   :  { %1751 = vmatprep.subr.mxu1 %v663_v8  ;;  %1675 = vmatpush1.msra.mxu0 %v470_v9  ;;  %v1860_v7 = vld [vmem:[#allocation2 + $0x48] sm:$0xff]  ;;  %v572_v8 = vld [vmem:[#allocation5 + $0xf80] sm:$0xff] }
 0x199   :  { %1752 = vmatpush1.msra.mxu1 %v662_v10  ;;  %1676 = vmatprep.subr.mxu0 %v465_v11  ;;  %v1861_v9 = vld [vmem:[#allocation2 + $0x40] sm:$0xff]  ;;  %v567_v11 = vld [vmem:[#allocation5 + $0xf58] sm:$0xff] }
 0x19a   :  { %1753 = vmatprep.subr.mxu1 %v657_v12  ;;  %1677 = vmatpush1.msra.mxu0 %v464_v13  ;;  %v764_v10 = vld [vmem:[#allocation5 + $0x1580] sm:$0xff]  ;;  %v759_v12 = vld [vmem:[#allocation5 + $0x1558] sm:$0xff] }
 0x19b   :  { %1754 = vmatpush1.msra.mxu1 %v656_v14  ;;  %1678 = vmatprep.subr.mxu0 %v651_v15  ;;  %v1862_v13 = vld [vmem:[#allocation2 + $0x58] sm:$0xff]  ;;  %v566_v14 = vld [vmem:[#allocation5 + $0xf50] sm:$0xff] }
 0x19c   :  { %1755 = vmatprep.subr.mxu1 %v843_v16  ;;  %1679 = vmatpush2.msra.mxu0 %v650_v17  ;;  %v758_v15 = vld [vmem:[#allocation5 + $0x1550] sm:$0xff]  ;;  %v561_v16 = vld [vmem:[#allocation5 + $0xf28] sm:$0xff] }
 0x19d   :  { %1756 = vmatpush2.msra.mxu1 %v842_v18  ;;  %1680 = vmatprep.subr.mxu0 %v645_v19  ;;  %v753_v17 = vld [vmem:[#allocation5 + $0x1528] sm:$0xff]  ;;  %v1863_v18 = vld [vmem:[#allocation2 + $0x50] sm:$0xff]  ;;  %v560_v19 = vld [vmem:[#allocation5 + $0xf20] sm:$0xff] }
 0x19e   :  { %1757 = vmatprep.subr.mxu1 %v837_v20  ;;  %1681 = vmatpush2.msra.mxu0 %v644_v21  ;;  %v752_v20 = vld [vmem:[#allocation5 + $0x1520] sm:$0xff]  ;;  %v1864_v21 = vld [vmem:[#allocation2 + $0x28] sm:$0xff] }
 0x19f   :  { %1758 = vmatpush2.msra.mxu1 %v836_v22  ;;  %1682 = vmatprep.subr.mxu0 %v639_v23  ;;  %v1865_v22 = vld [vmem:[#allocation2 + $0x38] sm:$0xff]  ;;  %v1866_v23 = vld [vmem:[#allocation2 + $0x20] sm:$0xff] }
 0x1a0   :  { %1759 = vmatprep.subr.mxu1 %v831_v24  ;;  %1683 = vmatpush2.msra.mxu0 %v638_v25  ;;  %v1867_v24 = vld [vmem:[#allocation2 + $0x30] sm:$0xff]  ;;  %v1868_v25 = vld [vmem:[#allocation2 + $0x68] sm:$0xff] }
 0x1a1   :  { %1760 = vmatpush2.msra.mxu1 %v830_v26  ;;  %1684 = vmatprep.subr.mxu0 %v633_v27  ;;  %v1869_v26 = vld [vmem:[#allocation2 + $0x78] sm:$0xff]  ;;  %v1870_v27 = vld [vmem:[#allocation2 + $0x60] sm:$0xff] }
 0x1a2   :  { %1761 = vmatprep.subr.mxu1 %v825_v28  ;;  %1685 = vmatpush2.msra.mxu0 %v632_v29  ;;  %v1871_v28 = vld [vmem:[#allocation2 + $0x70] sm:$0xff]  ;;  %v856_v29 = vsub.s32 2, %v2002_v45 }
 0x1a3   :  { %1762 = vmatpush2.msra.mxu1 %v824_v30  ;;  %1686 = vmatprep.subr.mxu0 %v627_v31  ;;  %v860_v31 = vsub.s32 3, %v2002_v45 }
 0x1a4   :  { %1763 = vmatprep.subr.mxu1 %v819_v32  ;;  %1687 = vmatpush2.msra.mxu0 %v626_v33  ;;  %v857_v33 = vrot.slane %v2005_v58, %v856_v29 }
 0x1a5   :  { %1764 = vmatpush2.msra.mxu1 %v818_v34  ;;  %1688 = vmatprep.subr.mxu0 %v621_v35  ;;  %v861_v35 = vrot.slane %v2005_v58, %v860_v31 }
 0x1a6   :  { %1765 = vmatprep.subr.mxu1 %v813_v36  ;;  %1689 = vmatpush2.msra.mxu0 %v620_v37 }
 0x1a7   :  { %1766 = vmatpush2.msra.mxu1 %v812_v38  ;;  %1690 = vmatprep.subr.mxu0 %v615_v39 }
 0x1a8   :  { %1767 = vmatprep.subr.mxu1 %v807_v40  ;;  %1691 = vmatpush2.msra.mxu0 %v614_v41 }
 0x1a9   :  { %1768 = vmatpush2.msra.mxu1 %v806_v42  ;;  %1692 = vmatprep.subr.mxu0 %v609_v43 }
 0x1aa   :  { %1769 = vmatprep.subr.mxu1 %v801_v44  ;;  %1693 = vmatpush2.msra.mxu0 %v608_v46 }
 0x1ab   :  { %1770 = vmatpush2.msra.mxu1 %v800_v47  ;;  %1694 = vmatprep.subr.mxu0 %v603_v48 }
 0x1ac   :  { %1771 = vmatprep.subr.mxu1 %v795_v49  ;;  %1695 = vmatpush2.msra.mxu0 %v602_v50 }
 0x1ad   :  { %1772 = vmatpush2.msra.mxu1 %v794_v51  ;;  %1696 = vmatprep.subr.mxu0 %v597_v52 }
 0x1ae   :  { %1773 = vmatprep.subr.mxu1 %v789_v53  ;;  %1697 = vmatpush2.msra.mxu0 %v596_v54 }
 0x1af   :  { %1774 = vmatpush2.msra.mxu1 %v788_v55  ;;  %1698 = vmatprep.subr.mxu0 %v591_v56 }
 0x1b0   :  { %1775 = vmatprep.subr.mxu1 %v783_v57  ;;  %1699 = vmatpush2.msra.mxu0 %v590_v59 }
 0x1b1   :  { %1776 = vmatpush2.msra.mxu1 %v782_v60  ;;  %1700 = vmatprep.subr.mxu0 %v585_v61 }
 0x1b2   :  { %1777 = vmatprep.subr.mxu1 %v777_v62  ;;  %1701 = vmatpush2.msra.mxu0 %v584_v63  ;;  %v1250_v30 = vpop.f32.mrf.mxu0 }
 0x1b3   :  { %1778 = vmatpush2.msra.mxu1 %v776_v0  ;;  %1702 = vmatprep.subr.mxu0 %v579_v1  ;;  %v1251_v38 = vadd.f32 %v1250_v30, %v857_v33 }
 0x1b4   :  { %1779 = vmatprep.subr.mxu1 %v771_v2  ;;  %1562 = vmatprep.mubr.f32.mxu0 %v1860_v7  ;;  %v1327_v32 = vpop.f32.mrf.mxu1  ;;  %v1252_v34 = vpop.f32.mrf.mxu0 }
 0x1b5   :  { %1703 = vmatpush2.msra.mxu0 %v578_v3  ;;  %1780 = vmatpush2.msra.mxu1 %v770_v4  ;;  %v1253_v41 = vadd.f32 %v1252_v34, %v861_v35  ;;  %v1328_v43 = vadd.f32 %v1327_v32, %v1251_v38  ;;  %v864_v3 = vsub.s32 4, %v2002_v45 }
 0x1b6   :  { %1563 = vmatmul.mubr.f32.gmra.mxu0 %v1861_v9  ;;  %1704 = vmatprep.subr.mxu0 %v573_v5  ;;  %v1329_v37 = vpop.f32.mrf.mxu1 }
 0x1b7   :  { %1781 = vmatprep.subr.mxu1 %v765_v6  ;;  %1639 = vmatprep.mubr.f32.mxu1 %v1862_v13  ;;  %v1330_v46 = vadd.f32 %v1329_v37, %v1253_v41  ;;  %v868_v6 = vsub.s32 5, %v2002_v45  ;;  %v865_v7 = vrot.slane %v2005_v58, %v864_v3 }
 0x1b8   :  { %1705 = vmatpush2.msra.mxu0 %v572_v8  ;;  %1782 = vmatpush2.msra.mxu1 %v764_v10 }
 0x1b9   :  { %1706 = vmatprep.subr.mxu0 %v567_v11  ;;  %1640 = vmatmul.mubr.f32.gmra.mxu1 %v1863_v18  ;;  %v869_v9 = vrot.slane %v2005_v58, %v868_v6 }
 0x1ba   :  { %1783 = vmatprep.subr.mxu1 %v759_v12  ;;  %1707 = vmatpush2.msra.mxu0 %v566_v14 }
 0x1bb   :  { %1784 = vmatpush2.msra.mxu1 %v758_v15  ;;  %1708 = vmatprep.subr.mxu0 %v561_v16 }
 0x1bc   :  { %1785 = vmatprep.subr.mxu1 %v753_v17  ;;  %1709 = vmatpush2.msra.mxu0 %v560_v19 }
 0x1bd   :  { %1710 = vmatprep.mubr.f32.mxu0 %v1864_v21  ;;  %1786 = vmatpush2.msra.mxu1 %v752_v20 }
 0x1be   :  { %1787 = vmatprep.mubr.f32.mxu1 %v1865_v22  ;;  %1711 = vmatmul.mubr.f32.vlgmr.msra.gmra.mxu0 %v1866_v23 }
 0x1bf   :  { %1788 = vmatmul.mubr.f32.vlgmr.msra.gmra.mxu1 %v1867_v24  ;;  %1716 = vmatprep.mubr.f32.mxu0 %v1868_v25 }
 0x1c0   :  { %1793 = vmatprep.mubr.f32.mxu1 %v1869_v26 }
 0x1c2   :  { %1717 = vmatmul.mubr.f32.gmra.mxu0 %v1870_v27 }
 0x1c3   :  { %1794 = vmatmul.mubr.f32.gmra.mxu1 %v1871_v28 }
 0x1ef   :  { %v1256_v36 = vpop.f32.mrf.mxu0 }
 0x1f0   :  { %v1257_v47 = vadd.f32 %v1256_v36, %v857_v33 }
 0x1f1   :  { %v1258_v39 = vpop.f32.mrf.mxu0 }
 0x1f2   :  { %v1333_v40 = vpop.f32.mrf.mxu1  ;;  %v1259_v51 = vadd.f32 %v1258_v39, %v861_v35 }
 0x1f3   :  { %v1334_v55 = vadd.f32 %v1333_v40, %v1257_v47 }
 0x1f4   :  { %v1335_v42 = vpop.f32.mrf.mxu1 }
 0x1f5   :  { %v1336_v59 = vadd.f32 %v1335_v42, %v1259_v51 }
 0x1f6   :  { %v1404_v44 = vpop.f32.mrf.mxu0 }
 0x1f7   :  { %v1405_v48 = vadd.f32 %v1404_v44, %v1328_v43 }
 0x1f8   :  { %v1481_v49 = vpop.f32.mrf.mxu1  ;;  %v1406_v50 = vpop.f32.mrf.mxu0 }
 0x1f9   :  { %v1482_v52 = vadd.f32 %v1481_v49, %v1405_v48  ;;  %v1407_v53 = vadd.f32 %v1406_v50, %v1330_v46 }
 0x1fa   :  { %v1483_v54 = vpop.f32.mrf.mxu1 }
 0x1fb   :  { %1802 = vst [vmem:[#allocation8 + $0x10] sm:$0xff] %v1482_v52  ;;  %v1484_v56 = vadd.f32 %v1483_v54, %v1407_v53 }
 0x1fc   :  { %v1410_v57 = vpop.f32.mrf.mxu0 }
 0x1fd   :  { %1803 = vst [vmem:[#allocation8 + $0x18] sm:$0xff] %v1484_v56  ;;  %v1411_v60 = vadd.f32 %v1410_v57, %v1334_v55 }
 0x1fe   :  { %v1412_v61 = vpop.f32.mrf.mxu0 }
 0x1ff   :  { %v1413_v62 = vadd.f32 %v1412_v61, %v1336_v59  ;;  %v1487_v63 = vpop.f32.mrf.mxu1 }
 0x200   :  { %v1488_v0 = vadd.f32 %v1487_v63, %v1411_v60 }
 0x201   :  { %v1489_v1 = vpop.f32.mrf.mxu1 }
 0x202   :  { %1808 = vst [vmem:[#allocation8 + $0x40] sm:$0xff] %v1488_v0  ;;  %v1490_v2 = vadd.f32 %v1489_v1, %v1413_v62 }
 0x204   :  { %1809 = vst [vmem:[#allocation8 + $0x48] sm:$0xff] %v1490_v2 }
 0x23a   :  { %v1558_v4 = vpop.f32.mrf.mxu0 }
 0x23b   :  { %v1559_v12 = vadd.f32 %v1558_v4, %v865_v7 }
 0x23c   :  { %v1635_v5 = vpop.f32.mrf.mxu1  ;;  %v1560_v8 = vpop.f32.mrf.mxu0 }
 0x23d   :  { %v1561_v14 = vadd.f32 %v1560_v8, %v869_v9  ;;  %v1636_v17 = vadd.f32 %v1635_v5, %v1559_v12 }
 0x23e   :  { %v1637_v10 = vpop.f32.mrf.mxu1 }
 0x23f   :  { %v1638_v21 = vadd.f32 %v1637_v10, %v1561_v14 }
 0x276   :  { %v1564_v11 = vpop.f32.mrf.mxu0 }
 0x277   :  { %v1565_v18 = vadd.f32 %v1564_v11, %v865_v7 }
 0x278   :  { %v1566_v16 = vpop.f32.mrf.mxu0 }
 0x279   :  { %v1641_v13 = vpop.f32.mrf.mxu1  ;;  %v1567_v22 = vadd.f32 %v1566_v16, %v869_v9 }
 0x27a   :  { %v1642_v25 = vadd.f32 %v1641_v13, %v1565_v18 }
 0x27b   :  { %v1643_v15 = vpop.f32.mrf.mxu1 }
 0x27c   :  { %v1644_v29 = vadd.f32 %v1643_v15, %v1567_v22 }
 0x27e   :  { %v1712_v19 = vpop.f32.mrf.mxu0 }
 0x27f   :  { %v1789_v20 = vpop.f32.mrf.mxu1  ;;  %v1713_v23 = vadd.f32 %v1712_v19, %v1636_v17 }
 0x280   :  { %v1714_v45 = vpop.f32.mrf.mxu0 }
 0x281   :  { %v1791_v24 = vpop.f32.mrf.mxu1  ;;  %v1790_v26 = vadd.f32 %v1789_v20, %v1713_v23  ;;  %v1715_v27 = vadd.f32 %v1714_v45, %v1638_v21 }
 0x282   :  { %v1718_v58 = vpop.f32.mrf.mxu0 }
 0x283   :  { %v1795_v28 = vpop.f32.mrf.mxu1  ;;  %1804 = vst [vmem:[#allocation8 + $0x20] sm:$0xff] %v1790_v26  ;;  %v1792_v30 = vadd.f32 %v1791_v24, %v1715_v27  ;;  %v1719_v31 = vadd.f32 %v1718_v58, %v1642_v25 }
 0x284   :  { %v1720_v32 = vpop.f32.mrf.mxu0 }
 0x285   :  { %1805 = vst [vmem:[#allocation8 + $0x28] sm:$0xff] %v1792_v30  ;;  %v1796_v33 = vadd.f32 %v1795_v28, %v1719_v31  ;;  %v1721_v34 = vadd.f32 %v1720_v32, %v1644_v29  ;;  %v1797_v35 = vpop.f32.mrf.mxu1 }
 0x287   :  { %1810 = vst [vmem:[#allocation8 + $0x50] sm:$0xff] %v1796_v33  ;;  %v1798_v36 = vadd.f32 %v1797_v35, %v1721_v34 }
 0x289   :  { %1811 = vst [vmem:[#allocation8 + $0x58] sm:$0xff] %v1798_v36 }
 0x28a   :  { %1946 = shalt.err (!%p1943_p5)
}
 0x28b   :  { %1823 = dma.vmem_to_hbm [thread:$0]  %s1818_s4, 1536, %s2027_s3, [#allocation4], %s1962_s18, %s1962_s18, %s1963_s19  }
 0x28c   :  { %1959 = dma.done.wait [#allocation4], 1536  }
 0x28d   :  { %1960 = vsyncadd [#allocation4], 4294965760 }
 0x28e   :  { %1827 = vsyncpa [#allocation3], 1 }
 0x28f   :  { %1828 = vsyncpa [#allocation6], 1 }
 0x290   :  { %1829 = vsyncpa [#allocation4], 1 }

</bundles_post_ra>
